<compile_context>
chip_gen: v7x
topology: tpu7x:2x2x1
jax: 0.10.0
libtpu: 0.0.40
codegen_flags: <defaults>
</compile_context>

<pallas_src>
import numpy as np
import jax
import jax.numpy as jnp
from jax.experimental import pallas as pl
from jax.experimental.pallas import tpu as pltpu


def _round_up(x, m):
    return (x + m - 1) // m * m


# ----------------------------------------------------------------------------
# Fused stage kernel: [conv3x3 + BN(eval) + LeakyReLU(0.2)] * n_layers
# ----------------------------------------------------------------------------
def _make_stage_kernel(layer_dims, p_flat, lm, taps):
    """layer_dims: list of (cin, cout) per layer (cin already padded to x8).
       p_flat:     flattened padded spatial size (H+2)*(W+2) of this stage.
       lm:         left margin (lane columns) of the activation scratch buffer.
       taps:       the 9 static lane offsets implementing the 3x3 taps.
    """
    n_layers = len(layer_dims)
    c_last = layer_dims[-1][1]

    def kernel(*refs):
        x_ref, mask_ref = refs[0], refs[1]          # (1,cin0,P) f32 / (1,P) f32
        o_ref = refs[2 + 3 * n_layers]              # (1, c_last, P) f32
        act = refs[3 + 3 * n_layers]                # (c_max, bufw)  f32 scratch
        xcol = refs[4 + 3 * n_layers]               # (9*c_max, P)   bf16 scratch

        # Zero the whole activation buffer: establishes the zero halo / margins
        # that implement the conv's 'same' padding for every layer of the stage.
        act[...] = jnp.zeros_like(act)
        cin0 = layer_dims[0][0]
        act[0:cin0, lm:lm + p_flat] = x_ref[0]
        mask = mask_ref[...]                        # 1.0 on interior pixels

        for l in range(n_layers):                   # static unroll over layers
            w_ref = refs[2 + 3 * l]                 # (cout, 9*cin) bf16
            s_ref = refs[3 + 3 * l]                 # (cout, 1)     f32
            b_ref = refs[4 + 3 * l]                 # (cout, 1)     f32
            cin, cout = layer_dims[l]

            # 9 shifted lane-slices of the padded activation -> contraction dim.
            for k, off in enumerate(taps):
                xcol[k * cin:(k + 1) * cin, :] = (
                    act[0:cin, lm + off:lm + off + p_flat]
                ).astype(jnp.bfloat16)

            # Single MXU matmul per layer: (cout, 9*cin) @ (9*cin, P), f32 acc.
            y = jnp.dot(w_ref[...], xcol[0:9 * cin, :],
                        preferred_element_type=jnp.float32)
            y = y * s_ref[...] + b_ref[...]         # folded conv-bias + BN(eval)
            y = jnp.where(y >= 0, y, 0.2 * y)       # LeakyReLU(0.2)
            y = y * mask                            # re-zero the padding ring
            act[0:cout, lm:lm + p_flat] = y

        o_ref[0] = act[0:c_last, lm:lm + p_flat].astype(o_ref.dtype)

    return kernel


# ----------------------------------------------------------------------------
# Stage runner: wrapper-side layout prep + fused pallas_call
# ----------------------------------------------------------------------------
def run_stage(x_nchw, layers, eps=1e-5):
    n, c_in, h, w = x_nchw.shape
    hp, wp = h + 2, w + 2
    p_flat = hp * wp
    lm = _round_up(wp + 1, 128)                 # lane-aligned left margin
    rm = wp + 1                                 # right margin (max tap shift)
    bufw = lm + p_flat + rm
    taps = [(ky - 1) * wp + (kx - 1) for ky in range(3) for kx in range(3)]

    # Pad input channels to a multiple of 8 (sublane alignment), add the 1-pixel
    # 'same'-padding frame, and flatten the padded frame onto the lane axis.
    # Input stays NCHW -> no transpose anywhere in the pipeline.
    cin0 = _round_up(c_in, 8)
    xp = jnp.pad(x_nchw, ((0, 0), (0, cin0 - c_in), (1, 1), (1, 1)))
    x_flat = xp.reshape(n, cin0, p_flat)

    mask_np = np.zeros((hp, wp), np.float32)
    mask_np[1:h + 1, 1:w + 1] = 1.0
    mask = jnp.asarray(mask_np.reshape(1, p_flat))

    inputs = [x_flat, mask]
    in_specs = [
        pl.BlockSpec((1, cin0, p_flat), lambda i: (i, 0, 0)),
        pl.BlockSpec((1, p_flat), lambda i: (0, 0)),
    ]

    layer_dims = []
    cin = cin0
    for prm in layers:
        w_oihw = prm["w_oihw"]
        cout, cin_real = w_oihw.shape[0], w_oihw.shape[1]
        wk = jnp.transpose(w_oihw, (0, 2, 3, 1))         # (cout, ky, kx, cin)
        if cin != cin_real:                              # zero-pad channel dim
            wk = jnp.pad(wk, ((0, 0), (0, 0), (0, 0), (0, cin - cin_real)))
        wmat = wk.reshape(cout, 9 * cin).astype(jnp.bfloat16)
        bn_scale = prm["gamma"] / jnp.sqrt(prm["var"] + eps)
        scale = bn_scale.reshape(cout, 1)
        bias = (bn_scale * (prm["b"] - prm["mean"]) + prm["beta"]).reshape(cout, 1)
        inputs += [wmat, scale, bias]
        in_specs += [
            pl.BlockSpec((cout, 9 * cin), lambda i: (0, 0)),
            pl.BlockSpec((cout, 1), lambda i: (0, 0)),
            pl.BlockSpec((cout, 1), lambda i: (0, 0)),
        ]
        layer_dims.append((cin, cout))
        cin = cout
    c_last = cin
    c_max = max(max(d) for d in layer_dims)

    kernel = _make_stage_kernel(layer_dims, p_flat, lm, taps)
    out_flat = pl.pallas_call(
        kernel,
        out_shape=jax.ShapeDtypeStruct((n, c_last, p_flat), x_nchw.dtype),
        grid_spec=pltpu.PrefetchScalarGridSpec(
            num_scalar_prefetch=0,
            grid=(n,),
            in_specs=in_specs,
            out_specs=pl.BlockSpec((1, c_last, p_flat), lambda i: (i, 0, 0)),
            scratch_shapes=[
                pltpu.VMEM((c_max, bufw), jnp.float32),        # activations
                pltpu.VMEM((9 * c_max, p_flat), jnp.bfloat16),  # im2col (K, P)
            ],
        ),
        compiler_params=pltpu.CompilerParams(
            dimension_semantics=("parallel",),    # lets v7x use both TensorCores
        ),
    )(*inputs)

    # Un-flatten the padded frame and crop the halo -> NCHW feature map.
    return out_flat.reshape(n, c_last, hp, wp)[:, :, 1:h + 1, 1:w + 1]


def max_pool_2x2(x_nchw):
    # TODO(synk): fusing the 2x2 maxpool into the stage kernel needs a stride-2
    # lane gather; at these sizes it is left as trivial XLA glue on the already
    # materialized stage output.
    n, c, h, w = x_nchw.shape
    return jnp.max(x_nchw.reshape(n, c, h // 2, 2, w // 2, 2), axis=(3, 5))


# ----------------------------------------------------------------------------
# Deterministic parameter construction (mirrors build_image_encoder.__init__)
# ----------------------------------------------------------------------------
def _init_conv_bn(key, cin, cout):
    kw, kb, kg, kbe = jax.random.split(key, 4)
    fan_in = cin * 9
    bound = 1.0 / np.sqrt(fan_in)
    return dict(
        w_oihw=jax.random.uniform(kw, (cout, cin, 3, 3), jnp.float32, -bound, bound),
        b=jax.random.uniform(kb, (cout,), jnp.float32, -bound, bound),
        gamma=jax.random.uniform(kg, (cout,), jnp.float32, 0.5, 1.5),
        beta=jax.random.uniform(kbe, (cout,), jnp.float32, -0.1, 0.1),
        mean=jnp.zeros((cout,), jnp.float32),       # BN running stats (eval)
        var=jnp.ones((cout,), jnp.float32),
    )


def build_image_encoder_params(key, input_shape, initial_num_filters,
                               output_map_width, layers_per_scale):
    if np.log2(input_shape[1] / output_map_width) % 1:
        raise ValueError("input width / output_map_width must be a power of 2")
    c_in = input_shape[0]
    stages = []
    k_iter = iter(jax.random.split(key, 64))

    layers = [_init_conv_bn(next(k_iter), c_in, initial_num_filters)]
    for _ in range(layers_per_scale):
        layers.append(_init_conv_bn(next(k_iter), initial_num_filters,
                                    initial_num_filters))
    stages.append(layers)

    width = input_shape[2]
    nf = initial_num_filters
    while width > output_map_width:
        layers = [_init_conv_bn(next(k_iter), nf, nf * 2)]
        for _ in range(layers_per_scale):
            layers.append(_init_conv_bn(next(k_iter), nf * 2, nf * 2))
        nf *= 2
        width //= 2
        stages.append(layers)
    return stages


# ----------------------------------------------------------------------------
# Forward pass (mirrors build_image_encoder.forward); I/O is NCHW throughout
# ----------------------------------------------------------------------------
def image_encoder_forward(x_nchw, stages):
    h1 = run_stage(x_nchw, stages[0])
    h2 = run_stage(max_pool_2x2(h1), stages[1])
    h3 = run_stage(max_pool_2x2(h2), stages[2])
    return h3, [h2, h1]


# ----------------------------------------------------------------------------
# Pure-JAX reference (for correctness check)
# ----------------------------------------------------------------------------
def _ref_layer(x, p, eps=1e-5):
    y = jax.lax.conv_general_dilated(
        x, p["w_oihw"], (1, 1), "SAME",
        dimension_numbers=("NCHW", "OIHW", "NCHW"),
        precision=jax.lax.Precision.HIGHEST)
    y = y + p["b"][None, :, None, None]
    scale = (p["gamma"] / jnp.sqrt(p["var"] + eps))[None, :, None, None]
    y = scale * (y - p["mean"][None, :, None, None]) + p["beta"][None, :, None, None]
    return jnp.where(y >= 0, y, 0.2 * y)


def _ref_forward(x_nchw, stages):
    def run(hx, layers):
        for prm in layers:
            hx = _ref_layer(hx, prm)
        return hx
    h1 = run(x_nchw, stages[0])
    h2 = run(max_pool_2x2(h1), stages[1])
    h3 = run(max_pool_2x2(h2), stages[2])
    return h3, [h2, h1]


if __name__ == "__main__":
    # small config: input (C=4, H=16, W=16), 8 initial filters, output map 4x4,
    # 1 extra layer per scale -> 3 stages, matching forward's conv[0..2].
    input_shape = (4, 16, 16)
    key = jax.random.PRNGKey(0)
    k_param, k_x = jax.random.split(key)
    stages = build_image_encoder_params(
        k_param, input_shape, initial_num_filters=8,
        output_map_width=4, layers_per_scale=1)

    x = jax.random.normal(k_x, (2,) + input_shape, dtype=jnp.float32)  # NCHW

    fwd = jax.jit(image_encoder_forward)
    h3, (h2, h1) = fwd(x, stages)
    jax.block_until_ready((h3, h2, h1))

    assert h1.shape == (2, 8, 16, 16), h1.shape
    assert h2.shape == (2, 16, 8, 8), h2.shape
    assert h3.shape == (2, 32, 4, 4), h3.shape

    r3, (r2, r1) = _ref_forward(x, stages)
    for got, ref in ((h1, r1), (h2, r2), (h3, r3)):
        assert bool(jnp.all(jnp.isfinite(got)))
        assert jnp.allclose(got, ref, rtol=5e-2, atol=5e-2), \
            float(jnp.max(jnp.abs(got - ref)))

    print("KERNEL_OK")
</pallas_src>

<mosaic_0001>
module attributes {stable_mosaic.version = 11 : i64} {
  func.func @kernel(%arg0: i32, %arg1: memref<1x8x324xf32, #tpu.memory_space<vmem>>, %arg2: memref<1x324xf32, #tpu.memory_space<vmem>>, %arg3: memref<8x72xbf16, #tpu.memory_space<vmem>>, %arg4: memref<8x1xf32, #tpu.memory_space<vmem>>, %arg5: memref<8x1xf32, #tpu.memory_space<vmem>>, %arg6: memref<8x72xbf16, #tpu.memory_space<vmem>>, %arg7: memref<8x1xf32, #tpu.memory_space<vmem>>, %arg8: memref<8x1xf32, #tpu.memory_space<vmem>>, %arg9: memref<1x8x324xf32, #tpu.memory_space<vmem>>, %arg10: memref<8x471xf32, #tpu.memory_space<vmem>>, %arg11: memref<72x324xbf16, #tpu.memory_space<vmem>>) attributes {dimension_semantics = [#tpu.dimension_semantics<parallel>], iteration_bounds = array<i64: 2>, scalar_prefetch = 0 : i64, scratch_operands = 2 : i64, tpu.core_type = #tpu.core_type<tc>, window_params = [{transform_indices = @transform_0, window_bounds = array<i64: 1, 8, 324>}, {pipeline_mode = #tpu.pipeline_mode<synchronous>, transform_indices = @transform_1, window_bounds = array<i64: 1, 324>}, {pipeline_mode = #tpu.pipeline_mode<synchronous>, transform_indices = @transform_2, window_bounds = array<i64: 8, 72>}, {pipeline_mode = #tpu.pipeline_mode<synchronous>, transform_indices = @transform_3, window_bounds = array<i64: 8, 1>}, {pipeline_mode = #tpu.pipeline_mode<synchronous>, transform_indices = @transform_4, window_bounds = array<i64: 8, 1>}, {pipeline_mode = #tpu.pipeline_mode<synchronous>, transform_indices = @transform_5, window_bounds = array<i64: 8, 72>}, {pipeline_mode = #tpu.pipeline_mode<synchronous>, transform_indices = @transform_6, window_bounds = array<i64: 8, 1>}, {pipeline_mode = #tpu.pipeline_mode<synchronous>, transform_indices = @transform_7, window_bounds = array<i64: 8, 1>}, {transform_indices = @transform_8, window_bounds = array<i64: 1, 8, 324>}]} {
    %cst = arith.constant 0.000000e+00 : f32
    %0 = vector.broadcast %cst : f32 to vector<8x471xf32>
    %c0 = arith.constant 0 : index
    %c0_0 = arith.constant 0 : index
    %1 = vector.load %arg10[%c0, %c0_0] : memref<8x471xf32, #tpu.memory_space<vmem>>, vector<8x471xf32>
    tpu.vector_store %arg10[%c0, %c0_0], %0 {strides = array<i32>} : memref<8x471xf32, #tpu.memory_space<vmem>>, vector<8x471xf32>,
    %c0_1 = arith.constant 0 : index
    %c0_2 = arith.constant 0 : index
    %c0_3 = arith.constant 0 : index
    %2 = vector.load %arg1[%c0_1, %c0_2, %c0_3] : memref<1x8x324xf32, #tpu.memory_space<vmem>>, vector<1x8x324xf32>
    %3 = vector.shape_cast %2 : vector<1x8x324xf32> to vector<8x324xf32>
    %c0_4 = arith.constant 0 : index
    %c128 = arith.constant 128 : index
    %4 = vector.load %arg10[%c0_4, %c128] : memref<8x471xf32, #tpu.memory_space<vmem>>, vector<8x324xf32>
    tpu.vector_store %arg10[%c0_4, %c128], %3 {strides = array<i32>} : memref<8x471xf32, #tpu.memory_space<vmem>>, vector<8x324xf32>,
    %c0_5 = arith.constant 0 : index
    %c0_6 = arith.constant 0 : index
    %5 = vector.load %arg2[%c0_5, %c0_6] : memref<1x324xf32, #tpu.memory_space<vmem>>, vector<1x324xf32>
    %c0_7 = arith.constant 0 : index
    %c109 = arith.constant 109 : index
    %6 = vector.load %arg10[%c0_7, %c109] : memref<8x471xf32, #tpu.memory_space<vmem>>, vector<8x324xf32>
    %7 = arith.truncf %6 : vector<8x324xf32> to vector<8x324xbf16>
    %c0_8 = arith.constant 0 : index
    %c0_9 = arith.constant 0 : index
    %8 = vector.load %arg11[%c0_8, %c0_9] : memref<72x324xbf16, #tpu.memory_space<vmem>>, vector<8x324xbf16>
    tpu.vector_store %arg11[%c0_8, %c0_9], %7 {strides = array<i32>} : memref<72x324xbf16, #tpu.memory_space<vmem>>, vector<8x324xbf16>,
    %c0_10 = arith.constant 0 : index
    %c110 = arith.constant 110 : index
    %9 = vector.load %arg10[%c0_10, %c110] : memref<8x471xf32, #tpu.memory_space<vmem>>, vector<8x324xf32>
    %10 = arith.truncf %9 : vector<8x324xf32> to vector<8x324xbf16>
    %c8 = arith.constant 8 : index
    %c0_11 = arith.constant 0 : index
    %11 = vector.load %arg11[%c8, %c0_11] : memref<72x324xbf16, #tpu.memory_space<vmem>>, vector<8x324xbf16>
    tpu.vector_store %arg11[%c8, %c0_11], %10 {strides = array<i32>} : memref<72x324xbf16, #tpu.memory_space<vmem>>, vector<8x324xbf16>,
    %c0_12 = arith.constant 0 : index
    %c111 = arith.constant 111 : index
    %12 = vector.load %arg10[%c0_12, %c111] : memref<8x471xf32, #tpu.memory_space<vmem>>, vector<8x324xf32>
    %13 = arith.truncf %12 : vector<8x324xf32> to vector<8x324xbf16>
    %c16 = arith.constant 16 : index
    %c0_13 = arith.constant 0 : index
    %14 = vector.load %arg11[%c16, %c0_13] : memref<72x324xbf16, #tpu.memory_space<vmem>>, vector<8x324xbf16>
    tpu.vector_store %arg11[%c16, %c0_13], %13 {strides = array<i32>} : memref<72x324xbf16, #tpu.memory_space<vmem>>, vector<8x324xbf16>,
    %c0_14 = arith.constant 0 : index
    %c127 = arith.constant 127 : index
    %15 = vector.load %arg10[%c0_14, %c127] : memref<8x471xf32, #tpu.memory_space<vmem>>, vector<8x324xf32>
    %16 = arith.truncf %15 : vector<8x324xf32> to vector<8x324xbf16>
    %c24 = arith.constant 24 : index
    %c0_15 = arith.constant 0 : index
    %17 = vector.load %arg11[%c24, %c0_15] : memref<72x324xbf16, #tpu.memory_space<vmem>>, vector<8x324xbf16>
    tpu.vector_store %arg11[%c24, %c0_15], %16 {strides = array<i32>} : memref<72x324xbf16, #tpu.memory_space<vmem>>, vector<8x324xbf16>,
    %c0_16 = arith.constant 0 : index
    %c128_17 = arith.constant 128 : index
    %18 = vector.load %arg10[%c0_16, %c128_17] : memref<8x471xf32, #tpu.memory_space<vmem>>, vector<8x324xf32>
    %19 = arith.truncf %18 : vector<8x324xf32> to vector<8x324xbf16>
    %c32 = arith.constant 32 : index
    %c0_18 = arith.constant 0 : index
    %20 = vector.load %arg11[%c32, %c0_18] : memref<72x324xbf16, #tpu.memory_space<vmem>>, vector<8x324xbf16>
    tpu.vector_store %arg11[%c32, %c0_18], %19 {strides = array<i32>} : memref<72x324xbf16, #tpu.memory_space<vmem>>, vector<8x324xbf16>,
    %c0_19 = arith.constant 0 : index
    %c129 = arith.constant 129 : index
    %21 = vector.load %arg10[%c0_19, %c129] : memref<8x471xf32, #tpu.memory_space<vmem>>, vector<8x324xf32>
    %22 = arith.truncf %21 : vector<8x324xf32> to vector<8x324xbf16>
    %c40 = arith.constant 40 : index
    %c0_20 = arith.constant 0 : index
    %23 = vector.load %arg11[%c40, %c0_20] : memref<72x324xbf16, #tpu.memory_space<vmem>>, vector<8x324xbf16>
    tpu.vector_store %arg11[%c40, %c0_20], %22 {strides = array<i32>} : memref<72x324xbf16, #tpu.memory_space<vmem>>, vector<8x324xbf16>,
    %c0_21 = arith.constant 0 : index
    %c145 = arith.constant 145 : index
    %24 = vector.load %arg10[%c0_21, %c145] : memref<8x471xf32, #tpu.memory_space<vmem>>, vector<8x324xf32>
    %25 = arith.truncf %24 : vector<8x324xf32> to vector<8x324xbf16>
    %c48 = arith.constant 48 : index
    %c0_22 = arith.constant 0 : index
    %26 = vector.load %arg11[%c48, %c0_22] : memref<72x324xbf16, #tpu.memory_space<vmem>>, vector<8x324xbf16>
    tpu.vector_store %arg11[%c48, %c0_22], %25 {strides = array<i32>} : memref<72x324xbf16, #tpu.memory_space<vmem>>, vector<8x324xbf16>,
    %c0_23 = arith.constant 0 : index
    %c146 = arith.constant 146 : index
    %27 = vector.load %arg10[%c0_23, %c146] : memref<8x471xf32, #tpu.memory_space<vmem>>, vector<8x324xf32>
    %28 = arith.truncf %27 : vector<8x324xf32> to vector<8x324xbf16>
    %c56 = arith.constant 56 : index
    %c0_24 = arith.constant 0 : index
    %29 = vector.load %arg11[%c56, %c0_24] : memref<72x324xbf16, #tpu.memory_space<vmem>>, vector<8x324xbf16>
    tpu.vector_store %arg11[%c56, %c0_24], %28 {strides = array<i32>} : memref<72x324xbf16, #tpu.memory_space<vmem>>, vector<8x324xbf16>,
    %c0_25 = arith.constant 0 : index
    %c147 = arith.constant 147 : index
    %30 = vector.load %arg10[%c0_25, %c147] : memref<8x471xf32, #tpu.memory_space<vmem>>, vector<8x324xf32>
    %31 = arith.truncf %30 : vector<8x324xf32> to vector<8x324xbf16>
    %c64 = arith.constant 64 : index
    %c0_26 = arith.constant 0 : index
    %32 = vector.load %arg11[%c64, %c0_26] : memref<72x324xbf16, #tpu.memory_space<vmem>>, vector<8x324xbf16>
    tpu.vector_store %arg11[%c64, %c0_26], %31 {strides = array<i32>} : memref<72x324xbf16, #tpu.memory_space<vmem>>, vector<8x324xbf16>,
    %c0_27 = arith.constant 0 : index
    %c0_28 = arith.constant 0 : index
    %33 = vector.load %arg3[%c0_27, %c0_28] : memref<8x72xbf16, #tpu.memory_space<vmem>>, vector<8x72xbf16>
    %c0_29 = arith.constant 0 : index
    %c0_30 = arith.constant 0 : index
    %34 = vector.load %arg11[%c0_29, %c0_30] : memref<72x324xbf16, #tpu.memory_space<vmem>>, vector<72x324xbf16>
    %cst_31 = arith.constant dense<0.000000e+00> : vector<8x324xf32>
    %35 = tpu.matmul %33, %34, %cst_31 {dimension_numbers = #tpu.dot_dimension_numbers<[1], [0], [0], [1], [0, 0, 1, 1], [], []>} : vector<8x72xbf16>, vector<72x324xbf16>, vector<8x324xf32> -> vector<8x324xf32>
    %c0_32 = arith.constant 0 : index
    %c0_33 = arith.constant 0 : index
    %36 = vector.load %arg4[%c0_32, %c0_33] : memref<8x1xf32, #tpu.memory_space<vmem>>, vector<8x1xf32>
    %37 = vector.broadcast %36 : vector<8x1xf32> to vector<8x324xf32>
    %38 = arith.mulf %35, %37 : vector<8x324xf32>
    %c0_34 = arith.constant 0 : index
    %c0_35 = arith.constant 0 : index
    %39 = vector.load %arg5[%c0_34, %c0_35] : memref<8x1xf32, #tpu.memory_space<vmem>>, vector<8x1xf32>
    %40 = vector.broadcast %39 : vector<8x1xf32> to vector<8x324xf32>
    %41 = arith.addf %38, %40 : vector<8x324xf32>
    %cst_36 = arith.constant 0.000000e+00 : f32
    %42 = vector.broadcast %cst_36 : f32 to vector<8x324xf32>
    %43 = arith.cmpf oge, %41, %42 : vector<8x324xf32>
    %cst_37 = arith.constant 2.000000e-01 : f32
    %44 = vector.broadcast %cst_37 : f32 to vector<8x324xf32>
    %45 = arith.mulf %44, %41 : vector<8x324xf32>
    %46 = arith.select %43, %41, %45 : vector<8x324xi1>, vector<8x324xf32>
    %47 = vector.broadcast %5 : vector<1x324xf32> to vector<8x324xf32>
    %48 = arith.mulf %46, %47 : vector<8x324xf32>
    %c0_38 = arith.constant 0 : index
    %c128_39 = arith.constant 128 : index
    %49 = vector.load %arg10[%c0_38, %c128_39] : memref<8x471xf32, #tpu.memory_space<vmem>>, vector<8x324xf32>
    tpu.vector_store %arg10[%c0_38, %c128_39], %48 {strides = array<i32>} : memref<8x471xf32, #tpu.memory_space<vmem>>, vector<8x324xf32>,
    %c0_40 = arith.constant 0 : index
    %c109_41 = arith.constant 109 : index
    %50 = vector.load %arg10[%c0_40, %c109_41] : memref<8x471xf32, #tpu.memory_space<vmem>>, vector<8x324xf32>
    %51 = arith.truncf %50 : vector<8x324xf32> to vector<8x324xbf16>
    %c0_42 = arith.constant 0 : index
    %c0_43 = arith.constant 0 : index
    %52 = vector.load %arg11[%c0_42, %c0_43] : memref<72x324xbf16, #tpu.memory_space<vmem>>, vector<8x324xbf16>
    tpu.vector_store %arg11[%c0_42, %c0_43], %51 {strides = array<i32>} : memref<72x324xbf16, #tpu.memory_space<vmem>>, vector<8x324xbf16>,
    %c0_44 = arith.constant 0 : index
    %c110_45 = arith.constant 110 : index
    %53 = vector.load %arg10[%c0_44, %c110_45] : memref<8x471xf32, #tpu.memory_space<vmem>>, vector<8x324xf32>
    %54 = arith.truncf %53 : vector<8x324xf32> to vector<8x324xbf16>
    %c8_46 = arith.constant 8 : index
    %c0_47 = arith.constant 0 : index
    %55 = vector.load %arg11[%c8_46, %c0_47] : memref<72x324xbf16, #tpu.memory_space<vmem>>, vector<8x324xbf16>
    tpu.vector_store %arg11[%c8_46, %c0_47], %54 {strides = array<i32>} : memref<72x324xbf16, #tpu.memory_space<vmem>>, vector<8x324xbf16>,
    %c0_48 = arith.constant 0 : index
    %c111_49 = arith.constant 111 : index
    %56 = vector.load %arg10[%c0_48, %c111_49] : memref<8x471xf32, #tpu.memory_space<vmem>>, vector<8x324xf32>
    %57 = arith.truncf %56 : vector<8x324xf32> to vector<8x324xbf16>
    %c16_50 = arith.constant 16 : index
    %c0_51 = arith.constant 0 : index
    %58 = vector.load %arg11[%c16_50, %c0_51] : memref<72x324xbf16, #tpu.memory_space<vmem>>, vector<8x324xbf16>
    tpu.vector_store %arg11[%c16_50, %c0_51], %57 {strides = array<i32>} : memref<72x324xbf16, #tpu.memory_space<vmem>>, vector<8x324xbf16>,
    %c0_52 = arith.constant 0 : index
    %c127_53 = arith.constant 127 : index
    %59 = vector.load %arg10[%c0_52, %c127_53] : memref<8x471xf32, #tpu.memory_space<vmem>>, vector<8x324xf32>
    %60 = arith.truncf %59 : vector<8x324xf32> to vector<8x324xbf16>
    %c24_54 = arith.constant 24 : index
    %c0_55 = arith.constant 0 : index
    %61 = vector.load %arg11[%c24_54, %c0_55] : memref<72x324xbf16, #tpu.memory_space<vmem>>, vector<8x324xbf16>
    tpu.vector_store %arg11[%c24_54, %c0_55], %60 {strides = array<i32>} : memref<72x324xbf16, #tpu.memory_space<vmem>>, vector<8x324xbf16>,
    %c0_56 = arith.constant 0 : index
    %c128_57 = arith.constant 128 : index
    %62 = vector.load %arg10[%c0_56, %c128_57] : memref<8x471xf32, #tpu.memory_space<vmem>>, vector<8x324xf32>
    %63 = arith.truncf %62 : vector<8x324xf32> to vector<8x324xbf16>
    %c32_58 = arith.constant 32 : index
    %c0_59 = arith.constant 0 : index
    %64 = vector.load %arg11[%c32_58, %c0_59] : memref<72x324xbf16, #tpu.memory_space<vmem>>, vector<8x324xbf16>
    tpu.vector_store %arg11[%c32_58, %c0_59], %63 {strides = array<i32>} : memref<72x324xbf16, #tpu.memory_space<vmem>>, vector<8x324xbf16>,
    %c0_60 = arith.constant 0 : index
    %c129_61 = arith.constant 129 : index
    %65 = vector.load %arg10[%c0_60, %c129_61] : memref<8x471xf32, #tpu.memory_space<vmem>>, vector<8x324xf32>
    %66 = arith.truncf %65 : vector<8x324xf32> to vector<8x324xbf16>
    %c40_62 = arith.constant 40 : index
    %c0_63 = arith.constant 0 : index
    %67 = vector.load %arg11[%c40_62, %c0_63] : memref<72x324xbf16, #tpu.memory_space<vmem>>, vector<8x324xbf16>
    tpu.vector_store %arg11[%c40_62, %c0_63], %66 {strides = array<i32>} : memref<72x324xbf16, #tpu.memory_space<vmem>>, vector<8x324xbf16>,
    %c0_64 = arith.constant 0 : index
    %c145_65 = arith.constant 145 : index
    %68 = vector.load %arg10[%c0_64, %c145_65] : memref<8x471xf32, #tpu.memory_space<vmem>>, vector<8x324xf32>
    %69 = arith.truncf %68 : vector<8x324xf32> to vector<8x324xbf16>
    %c48_66 = arith.constant 48 : index
    %c0_67 = arith.constant 0 : index
    %70 = vector.load %arg11[%c48_66, %c0_67] : memref<72x324xbf16, #tpu.memory_space<vmem>>, vector<8x324xbf16>
    tpu.vector_store %arg11[%c48_66, %c0_67], %69 {strides = array<i32>} : memref<72x324xbf16, #tpu.memory_space<vmem>>, vector<8x324xbf16>,
    %c0_68 = arith.constant 0 : index
    %c146_69 = arith.constant 146 : index
    %71 = vector.load %arg10[%c0_68, %c146_69] : memref<8x471xf32, #tpu.memory_space<vmem>>, vector<8x324xf32>
    %72 = arith.truncf %71 : vector<8x324xf32> to vector<8x324xbf16>
    %c56_70 = arith.constant 56 : index
    %c0_71 = arith.constant 0 : index
    %73 = vector.load %arg11[%c56_70, %c0_71] : memref<72x324xbf16, #tpu.memory_space<vmem>>, vector<8x324xbf16>
    tpu.vector_store %arg11[%c56_70, %c0_71], %72 {strides = array<i32>} : memref<72x324xbf16, #tpu.memory_space<vmem>>, vector<8x324xbf16>,
    %c0_72 = arith.constant 0 : index
    %c147_73 = arith.constant 147 : index
    %74 = vector.load %arg10[%c0_72, %c147_73] : memref<8x471xf32, #tpu.memory_space<vmem>>, vector<8x324xf32>
    %75 = arith.truncf %74 : vector<8x324xf32> to vector<8x324xbf16>
    %c64_74 = arith.constant 64 : index
    %c0_75 = arith.constant 0 : index
    %76 = vector.load %arg11[%c64_74, %c0_75] : memref<72x324xbf16, #tpu.memory_space<vmem>>, vector<8x324xbf16>
    tpu.vector_store %arg11[%c64_74, %c0_75], %75 {strides = array<i32>} : memref<72x324xbf16, #tpu.memory_space<vmem>>, vector<8x324xbf16>,
    %c0_76 = arith.constant 0 : index
    %c0_77 = arith.constant 0 : index
    %77 = vector.load %arg6[%c0_76, %c0_77] : memref<8x72xbf16, #tpu.memory_space<vmem>>, vector<8x72xbf16>
    %c0_78 = arith.constant 0 : index
    %c0_79 = arith.constant 0 : index
    %78 = vector.load %arg11[%c0_78, %c0_79] : memref<72x324xbf16, #tpu.memory_space<vmem>>, vector<72x324xbf16>
    %cst_80 = arith.constant dense<0.000000e+00> : vector<8x324xf32>
    %79 = tpu.matmul %77, %78, %cst_80 {dimension_numbers = #tpu.dot_dimension_numbers<[1], [0], [0], [1], [0, 0, 1, 1], [], []>} : vector<8x72xbf16>, vector<72x324xbf16>, vector<8x324xf32> -> vector<8x324xf32>
    %c0_81 = arith.constant 0 : index
    %c0_82 = arith.constant 0 : index
    %80 = vector.load %arg7[%c0_81, %c0_82] : memref<8x1xf32, #tpu.memory_space<vmem>>, vector<8x1xf32>
    %81 = vector.broadcast %80 : vector<8x1xf32> to vector<8x324xf32>
    %82 = arith.mulf %79, %81 : vector<8x324xf32>
    %c0_83 = arith.constant 0 : index
    %c0_84 = arith.constant 0 : index
    %83 = vector.load %arg8[%c0_83, %c0_84] : memref<8x1xf32, #tpu.memory_space<vmem>>, vector<8x1xf32>
    %84 = vector.broadcast %83 : vector<8x1xf32> to vector<8x324xf32>
    %85 = arith.addf %82, %84 : vector<8x324xf32>
    %cst_85 = arith.constant 0.000000e+00 : f32
    %86 = vector.broadcast %cst_85 : f32 to vector<8x324xf32>
    %87 = arith.cmpf oge, %85, %86 : vector<8x324xf32>
    %cst_86 = arith.constant 2.000000e-01 : f32
    %88 = vector.broadcast %cst_86 : f32 to vector<8x324xf32>
    %89 = arith.mulf %88, %85 : vector<8x324xf32>
    %90 = arith.select %87, %85, %89 : vector<8x324xi1>, vector<8x324xf32>
    %91 = vector.broadcast %5 : vector<1x324xf32> to vector<8x324xf32>
    %92 = arith.mulf %90, %91 : vector<8x324xf32>
    %c0_87 = arith.constant 0 : index
    %c128_88 = arith.constant 128 : index
    %93 = vector.load %arg10[%c0_87, %c128_88] : memref<8x471xf32, #tpu.memory_space<vmem>>, vector<8x324xf32>
    tpu.vector_store %arg10[%c0_87, %c128_88], %92 {strides = array<i32>} : memref<8x471xf32, #tpu.memory_space<vmem>>, vector<8x324xf32>,
    %c0_89 = arith.constant 0 : index
    %c128_90 = arith.constant 128 : index
    %94 = vector.load %arg10[%c0_89, %c128_90] : memref<8x471xf32, #tpu.memory_space<vmem>>, vector<8x324xf32>
    %c0_91 = arith.constant 0 : index
    %c0_92 = arith.constant 0 : index
    %c0_93 = arith.constant 0 : index
    %95 = vector.load %arg9[%c0_91, %c0_92, %c0_93] : memref<1x8x324xf32, #tpu.memory_space<vmem>>, vector<1x8x324xf32>
    %96 = vector.shape_cast %95 : vector<1x8x324xf32> to vector<8x324xf32>
    %97 = vector.shape_cast %94 : vector<8x324xf32> to vector<1x8x324xf32>
    tpu.vector_store %arg9[%c0_91, %c0_92, %c0_93], %97 {strides = array<i32>} : memref<1x8x324xf32, #tpu.memory_space<vmem>>, vector<1x8x324xf32>,
    return
  }
  func.func @transform_0(%arg0: i32) -> (i32, i32, i32) {
    %c0_i32 = arith.constant 0 : i32
    %c0_i32_0 = arith.constant 0 : i32
    %c0_i32_1 = arith.constant 0 : i32
    return %arg0, %c0_i32, %c0_i32_0 : i32, i32, i32
  }
  func.func @transform_1(%arg0: i32) -> (i32, i32) {
    %c0_i32 = arith.constant 0 : i32
    %c0_i32_0 = arith.constant 0 : i32
    %c0_i32_1 = arith.constant 0 : i32
    return %c0_i32, %c0_i32_0 : i32, i32
  }
  func.func @transform_2(%arg0: i32) -> (i32, i32) {
    %c0_i32 = arith.constant 0 : i32
    %c0_i32_0 = arith.constant 0 : i32
    %c0_i32_1 = arith.constant 0 : i32
    return %c0_i32, %c0_i32_0 : i32, i32
  }
  func.func @transform_3(%arg0: i32) -> (i32, i32) {
    %c0_i32 = arith.constant 0 : i32
    %c0_i32_0 = arith.constant 0 : i32
    %c0_i32_1 = arith.constant 0 : i32
    return %c0_i32, %c0_i32_0 : i32, i32
  }
  func.func @transform_4(%arg0: i32) -> (i32, i32) {
    %c0_i32 = arith.constant 0 : i32
    %c0_i32_0 = arith.constant 0 : i32
    %c0_i32_1 = arith.constant 0 : i32
    return %c0_i32, %c0_i32_0 : i32, i32
  }
  func.func @transform_5(%arg0: i32) -> (i32, i32) {
    %c0_i32 = arith.constant 0 : i32
    %c0_i32_0 = arith.constant 0 : i32
    %c0_i32_1 = arith.constant 0 : i32
    return %c0_i32, %c0_i32_0 : i32, i32
  }
  func.func @transform_6(%arg0: i32) -> (i32, i32) {
    %c0_i32 = arith.constant 0 : i32
    %c0_i32_0 = arith.constant 0 : i32
    %c0_i32_1 = arith.constant 0 : i32
    return %c0_i32, %c0_i32_0 : i32, i32
  }
  func.func @transform_7(%arg0: i32) -> (i32, i32) {
    %c0_i32 = arith.constant 0 : i32
    %c0_i32_0 = arith.constant 0 : i32
    %c0_i32_1 = arith.constant 0 : i32
    return %c0_i32, %c0_i32_0 : i32, i32
  }
  func.func @transform_8(%arg0: i32) -> (i32, i32, i32) {
    %c0_i32 = arith.constant 0 : i32
    %c0_i32_0 = arith.constant 0 : i32
    %c0_i32_1 = arith.constant 0 : i32
    return %arg0, %c0_i32, %c0_i32_0 : i32, i32, i32
  }
}

module attributes {stable_mosaic.version = 11 : i64} {
  func.func @kernel(%arg0: i32, %arg1: memref<1x8x100xf32, #tpu.memory_space<vmem>>, %arg2: memref<1x100xf32, #tpu.memory_space<vmem>>, %arg3: memref<16x72xbf16, #tpu.memory_space<vmem>>, %arg4: memref<16x1xf32, #tpu.memory_space<vmem>>, %arg5: memref<16x1xf32, #tpu.memory_space<vmem>>, %arg6: memref<16x144xbf16, #tpu.memory_space<vmem>>, %arg7: memref<16x1xf32, #tpu.memory_space<vmem>>, %arg8: memref<16x1xf32, #tpu.memory_space<vmem>>, %arg9: memref<1x16x100xf32, #tpu.memory_space<vmem>>, %arg10: memref<16x239xf32, #tpu.memory_space<vmem>>, %arg11: memref<144x100xbf16, #tpu.memory_space<vmem>>) attributes {dimension_semantics = [#tpu.dimension_semantics<parallel>], iteration_bounds = array<i64: 2>, scalar_prefetch = 0 : i64, scratch_operands = 2 : i64, tpu.core_type = #tpu.core_type<tc>, window_params = [{transform_indices = @transform_0, window_bounds = array<i64: 1, 8, 100>}, {pipeline_mode = #tpu.pipeline_mode<synchronous>, transform_indices = @transform_1, window_bounds = array<i64: 1, 100>}, {pipeline_mode = #tpu.pipeline_mode<synchronous>, transform_indices = @transform_2, window_bounds = array<i64: 16, 72>}, {pipeline_mode = #tpu.pipeline_mode<synchronous>, transform_indices = @transform_3, window_bounds = array<i64: 16, 1>}, {pipeline_mode = #tpu.pipeline_mode<synchronous>, transform_indices = @transform_4, window_bounds = array<i64: 16, 1>}, {pipeline_mode = #tpu.pipeline_mode<synchronous>, transform_indices = @transform_5, window_bounds = array<i64: 16, 144>}, {pipeline_mode = #tpu.pipeline_mode<synchronous>, transform_indices = @transform_6, window_bounds = array<i64: 16, 1>}, {pipeline_mode = #tpu.pipeline_mode<synchronous>, transform_indices = @transform_7, window_bounds = array<i64: 16, 1>}, {transform_indices = @transform_8, window_bounds = array<i64: 1, 16, 100>}]} {
    %cst = arith.constant 0.000000e+00 : f32
    %0 = vector.broadcast %cst : f32 to vector<16x239xf32>
    %c0 = arith.constant 0 : index
    %c0_0 = arith.constant 0 : index
    %1 = vector.load %arg10[%c0, %c0_0] : memref<16x239xf32, #tpu.memory_space<vmem>>, vector<16x239xf32>
    tpu.vector_store %arg10[%c0, %c0_0], %0 {strides = array<i32>} : memref<16x239xf32, #tpu.memory_space<vmem>>, vector<16x239xf32>,
    %c0_1 = arith.constant 0 : index
    %c0_2 = arith.constant 0 : index
    %c0_3 = arith.constant 0 : index
    %2 = vector.load %arg1[%c0_1, %c0_2, %c0_3] : memref<1x8x100xf32, #tpu.memory_space<vmem>>, vector<1x8x100xf32>
    %3 = vector.shape_cast %2 : vector<1x8x100xf32> to vector<8x100xf32>
    %c0_4 = arith.constant 0 : index
    %c128 = arith.constant 128 : index
    %4 = vector.load %arg10[%c0_4, %c128] : memref<16x239xf32, #tpu.memory_space<vmem>>, vector<8x100xf32>
    tpu.vector_store %arg10[%c0_4, %c128], %3 {strides = array<i32>} : memref<16x239xf32, #tpu.memory_space<vmem>>, vector<8x100xf32>,
    %c0_5 = arith.constant 0 : index
    %c0_6 = arith.constant 0 : index
    %5 = vector.load %arg2[%c0_5, %c0_6] : memref<1x100xf32, #tpu.memory_space<vmem>>, vector<1x100xf32>
    %c0_7 = arith.constant 0 : index
    %c117 = arith.constant 117 : index
    %6 = vector.load %arg10[%c0_7, %c117] : memref<16x239xf32, #tpu.memory_space<vmem>>, vector<8x100xf32>
    %7 = arith.truncf %6 : vector<8x100xf32> to vector<8x100xbf16>
    %c0_8 = arith.constant 0 : index
    %c0_9 = arith.constant 0 : index
    %8 = vector.load %arg11[%c0_8, %c0_9] : memref<144x100xbf16, #tpu.memory_space<vmem>>, vector<8x100xbf16>
    tpu.vector_store %arg11[%c0_8, %c0_9], %7 {strides = array<i32>} : memref<144x100xbf16, #tpu.memory_space<vmem>>, vector<8x100xbf16>,
    %c0_10 = arith.constant 0 : index
    %c118 = arith.constant 118 : index
    %9 = vector.load %arg10[%c0_10, %c118] : memref<16x239xf32, #tpu.memory_space<vmem>>, vector<8x100xf32>
    %10 = arith.truncf %9 : vector<8x100xf32> to vector<8x100xbf16>
    %c8 = arith.constant 8 : index
    %c0_11 = arith.constant 0 : index
    %11 = vector.load %arg11[%c8, %c0_11] : memref<144x100xbf16, #tpu.memory_space<vmem>>, vector<8x100xbf16>
    tpu.vector_store %arg11[%c8, %c0_11], %10 {strides = array<i32>} : memref<144x100xbf16, #tpu.memory_space<vmem>>, vector<8x100xbf16>,
    %c0_12 = arith.constant 0 : index
    %c119 = arith.constant 119 : index
    %12 = vector.load %arg10[%c0_12, %c119] : memref<16x239xf32, #tpu.memory_space<vmem>>, vector<8x100xf32>
    %13 = arith.truncf %12 : vector<8x100xf32> to vector<8x100xbf16>
    %c16 = arith.constant 16 : index
    %c0_13 = arith.constant 0 : index
    %14 = vector.load %arg11[%c16, %c0_13] : memref<144x100xbf16, #tpu.memory_space<vmem>>, vector<8x100xbf16>
    tpu.vector_store %arg11[%c16, %c0_13], %13 {strides = array<i32>} : memref<144x100xbf16, #tpu.memory_space<vmem>>, vector<8x100xbf16>,
    %c0_14 = arith.constant 0 : index
    %c127 = arith.constant 127 : index
    %15 = vector.load %arg10[%c0_14, %c127] : memref<16x239xf32, #tpu.memory_space<vmem>>, vector<8x100xf32>
    %16 = arith.truncf %15 : vector<8x100xf32> to vector<8x100xbf16>
    %c24 = arith.constant 24 : index
    %c0_15 = arith.constant 0 : index
    %17 = vector.load %arg11[%c24, %c0_15] : memref<144x100xbf16, #tpu.memory_space<vmem>>, vector<8x100xbf16>
    tpu.vector_store %arg11[%c24, %c0_15], %16 {strides = array<i32>} : memref<144x100xbf16, #tpu.memory_space<vmem>>, vector<8x100xbf16>,
    %c0_16 = arith.constant 0 : index
    %c128_17 = arith.constant 128 : index
    %18 = vector.load %arg10[%c0_16, %c128_17] : memref<16x239xf32, #tpu.memory_space<vmem>>, vector<8x100xf32>
    %19 = arith.truncf %18 : vector<8x100xf32> to vector<8x100xbf16>
    %c32 = arith.constant 32 : index
    %c0_18 = arith.constant 0 : index
    %20 = vector.load %arg11[%c32, %c0_18] : memref<144x100xbf16, #tpu.memory_space<vmem>>, vector<8x100xbf16>
    tpu.vector_store %arg11[%c32, %c0_18], %19 {strides = array<i32>} : memref<144x100xbf16, #tpu.memory_space<vmem>>, vector<8x100xbf16>,
    %c0_19 = arith.constant 0 : index
    %c129 = arith.constant 129 : index
    %21 = vector.load %arg10[%c0_19, %c129] : memref<16x239xf32, #tpu.memory_space<vmem>>, vector<8x100xf32>
    %22 = arith.truncf %21 : vector<8x100xf32> to vector<8x100xbf16>
    %c40 = arith.constant 40 : index
    %c0_20 = arith.constant 0 : index
    %23 = vector.load %arg11[%c40, %c0_20] : memref<144x100xbf16, #tpu.memory_space<vmem>>, vector<8x100xbf16>
    tpu.vector_store %arg11[%c40, %c0_20], %22 {strides = array<i32>} : memref<144x100xbf16, #tpu.memory_space<vmem>>, vector<8x100xbf16>,
    %c0_21 = arith.constant 0 : index
    %c137 = arith.constant 137 : index
    %24 = vector.load %arg10[%c0_21, %c137] : memref<16x239xf32, #tpu.memory_space<vmem>>, vector<8x100xf32>
    %25 = arith.truncf %24 : vector<8x100xf32> to vector<8x100xbf16>
    %c48 = arith.constant 48 : index
    %c0_22 = arith.constant 0 : index
    %26 = vector.load %arg11[%c48, %c0_22] : memref<144x100xbf16, #tpu.memory_space<vmem>>, vector<8x100xbf16>
    tpu.vector_store %arg11[%c48, %c0_22], %25 {strides = array<i32>} : memref<144x100xbf16, #tpu.memory_space<vmem>>, vector<8x100xbf16>,
    %c0_23 = arith.constant 0 : index
    %c138 = arith.constant 138 : index
    %27 = vector.load %arg10[%c0_23, %c138] : memref<16x239xf32, #tpu.memory_space<vmem>>, vector<8x100xf32>
    %28 = arith.truncf %27 : vector<8x100xf32> to vector<8x100xbf16>
    %c56 = arith.constant 56 : index
    %c0_24 = arith.constant 0 : index
    %29 = vector.load %arg11[%c56, %c0_24] : memref<144x100xbf16, #tpu.memory_space<vmem>>, vector<8x100xbf16>
    tpu.vector_store %arg11[%c56, %c0_24], %28 {strides = array<i32>} : memref<144x100xbf16, #tpu.memory_space<vmem>>, vector<8x100xbf16>,
    %c0_25 = arith.constant 0 : index
    %c139 = arith.constant 139 : index
    %30 = vector.load %arg10[%c0_25, %c139] : memref<16x239xf32, #tpu.memory_space<vmem>>, vector<8x100xf32>
    %31 = arith.truncf %30 : vector<8x100xf32> to vector<8x100xbf16>
    %c64 = arith.constant 64 : index
    %c0_26 = arith.constant 0 : index
    %32 = vector.load %arg11[%c64, %c0_26] : memref<144x100xbf16, #tpu.memory_space<vmem>>, vector<8x100xbf16>
    tpu.vector_store %arg11[%c64, %c0_26], %31 {strides = array<i32>} : memref<144x100xbf16, #tpu.memory_space<vmem>>, vector<8x100xbf16>,
    %c0_27 = arith.constant 0 : index
    %c0_28 = arith.constant 0 : index
    %33 = vector.load %arg3[%c0_27, %c0_28] : memref<16x72xbf16, #tpu.memory_space<vmem>>, vector<16x72xbf16>
    %c0_29 = arith.constant 0 : index
    %c0_30 = arith.constant 0 : index
    %34 = vector.load %arg11[%c0_29, %c0_30] : memref<144x100xbf16, #tpu.memory_space<vmem>>, vector<72x100xbf16>
    %cst_31 = arith.constant dense<0.000000e+00> : vector<16x100xf32>
    %35 = tpu.matmul %33, %34, %cst_31 {dimension_numbers = #tpu.dot_dimension_numbers<[1], [0], [0], [1], [0, 0, 1, 1], [], []>} : vector<16x72xbf16>, vector<72x100xbf16>, vector<16x100xf32> -> vector<16x100xf32>
    %c0_32 = arith.constant 0 : index
    %c0_33 = arith.constant 0 : index
    %36 = vector.load %arg4[%c0_32, %c0_33] : memref<16x1xf32, #tpu.memory_space<vmem>>, vector<16x1xf32>
    %37 = vector.broadcast %36 : vector<16x1xf32> to vector<16x100xf32>
    %38 = arith.mulf %35, %37 : vector<16x100xf32>
    %c0_34 = arith.constant 0 : index
    %c0_35 = arith.constant 0 : index
    %39 = vector.load %arg5[%c0_34, %c0_35] : memref<16x1xf32, #tpu.memory_space<vmem>>, vector<16x1xf32>
    %40 = vector.broadcast %39 : vector<16x1xf32> to vector<16x100xf32>
    %41 = arith.addf %38, %40 : vector<16x100xf32>
    %cst_36 = arith.constant 0.000000e+00 : f32
    %42 = vector.broadcast %cst_36 : f32 to vector<16x100xf32>
    %43 = arith.cmpf oge, %41, %42 : vector<16x100xf32>
    %cst_37 = arith.constant 2.000000e-01 : f32
    %44 = vector.broadcast %cst_37 : f32 to vector<16x100xf32>
    %45 = arith.mulf %44, %41 : vector<16x100xf32>
    %46 = arith.select %43, %41, %45 : vector<16x100xi1>, vector<16x100xf32>
    %47 = vector.broadcast %5 : vector<1x100xf32> to vector<16x100xf32>
    %48 = arith.mulf %46, %47 : vector<16x100xf32>
    %c0_38 = arith.constant 0 : index
    %c128_39 = arith.constant 128 : index
    %49 = vector.load %arg10[%c0_38, %c128_39] : memref<16x239xf32, #tpu.memory_space<vmem>>, vector<16x100xf32>
    tpu.vector_store %arg10[%c0_38, %c128_39], %48 {strides = array<i32>} : memref<16x239xf32, #tpu.memory_space<vmem>>, vector<16x100xf32>,
    %c0_40 = arith.constant 0 : index
    %c117_41 = arith.constant 117 : index
    %50 = vector.load %arg10[%c0_40, %c117_41] : memref<16x239xf32, #tpu.memory_space<vmem>>, vector<16x100xf32>
    %51 = arith.truncf %50 : vector<16x100xf32> to vector<16x100xbf16>
    %c0_42 = arith.constant 0 : index
    %c0_43 = arith.constant 0 : index
    %52 = vector.load %arg11[%c0_42, %c0_43] : memref<144x100xbf16, #tpu.memory_space<vmem>>, vector<16x100xbf16>
    tpu.vector_store %arg11[%c0_42, %c0_43], %51 {strides = array<i32>} : memref<144x100xbf16, #tpu.memory_space<vmem>>, vector<16x100xbf16>,
    %c0_44 = arith.constant 0 : index
    %c118_45 = arith.constant 118 : index
    %53 = vector.load %arg10[%c0_44, %c118_45] : memref<16x239xf32, #tpu.memory_space<vmem>>, vector<16x100xf32>
    %54 = arith.truncf %53 : vector<16x100xf32> to vector<16x100xbf16>
    %c16_46 = arith.constant 16 : index
    %c0_47 = arith.constant 0 : index
    %55 = vector.load %arg11[%c16_46, %c0_47] : memref<144x100xbf16, #tpu.memory_space<vmem>>, vector<16x100xbf16>
    tpu.vector_store %arg11[%c16_46, %c0_47], %54 {strides = array<i32>} : memref<144x100xbf16, #tpu.memory_space<vmem>>, vector<16x100xbf16>,
    %c0_48 = arith.constant 0 : index
    %c119_49 = arith.constant 119 : index
    %56 = vector.load %arg10[%c0_48, %c119_49] : memref<16x239xf32, #tpu.memory_space<vmem>>, vector<16x100xf32>
    %57 = arith.truncf %56 : vector<16x100xf32> to vector<16x100xbf16>
    %c32_50 = arith.constant 32 : index
    %c0_51 = arith.constant 0 : index
    %58 = vector.load %arg11[%c32_50, %c0_51] : memref<144x100xbf16, #tpu.memory_space<vmem>>, vector<16x100xbf16>
    tpu.vector_store %arg11[%c32_50, %c0_51], %57 {strides = array<i32>} : memref<144x100xbf16, #tpu.memory_space<vmem>>, vector<16x100xbf16>,
    %c0_52 = arith.constant 0 : index
    %c127_53 = arith.constant 127 : index
    %59 = vector.load %arg10[%c0_52, %c127_53] : memref<16x239xf32, #tpu.memory_space<vmem>>, vector<16x100xf32>
    %60 = arith.truncf %59 : vector<16x100xf32> to vector<16x100xbf16>
    %c48_54 = arith.constant 48 : index
    %c0_55 = arith.constant 0 : index
    %61 = vector.load %arg11[%c48_54, %c0_55] : memref<144x100xbf16, #tpu.memory_space<vmem>>, vector<16x100xbf16>
    tpu.vector_store %arg11[%c48_54, %c0_55], %60 {strides = array<i32>} : memref<144x100xbf16, #tpu.memory_space<vmem>>, vector<16x100xbf16>,
    %c0_56 = arith.constant 0 : index
    %c128_57 = arith.constant 128 : index
    %62 = vector.load %arg10[%c0_56, %c128_57] : memref<16x239xf32, #tpu.memory_space<vmem>>, vector<16x100xf32>
    %63 = arith.truncf %62 : vector<16x100xf32> to vector<16x100xbf16>
    %c64_58 = arith.constant 64 : index
    %c0_59 = arith.constant 0 : index
    %64 = vector.load %arg11[%c64_58, %c0_59] : memref<144x100xbf16, #tpu.memory_space<vmem>>, vector<16x100xbf16>
    tpu.vector_store %arg11[%c64_58, %c0_59], %63 {strides = array<i32>} : memref<144x100xbf16, #tpu.memory_space<vmem>>, vector<16x100xbf16>,
    %c0_60 = arith.constant 0 : index
    %c129_61 = arith.constant 129 : index
    %65 = vector.load %arg10[%c0_60, %c129_61] : memref<16x239xf32, #tpu.memory_space<vmem>>, vector<16x100xf32>
    %66 = arith.truncf %65 : vector<16x100xf32> to vector<16x100xbf16>
    %c80 = arith.constant 80 : index
    %c0_62 = arith.constant 0 : index
    %67 = vector.load %arg11[%c80, %c0_62] : memref<144x100xbf16, #tpu.memory_space<vmem>>, vector<16x100xbf16>
    tpu.vector_store %arg11[%c80, %c0_62], %66 {strides = array<i32>} : memref<144x100xbf16, #tpu.memory_space<vmem>>, vector<16x100xbf16>,
    %c0_63 = arith.constant 0 : index
    %c137_64 = arith.constant 137 : index
    %68 = vector.load %arg10[%c0_63, %c137_64] : memref<16x239xf32, #tpu.memory_space<vmem>>, vector<16x100xf32>
    %69 = arith.truncf %68 : vector<16x100xf32> to vector<16x100xbf16>
    %c96 = arith.constant 96 : index
    %c0_65 = arith.constant 0 : index
    %70 = vector.load %arg11[%c96, %c0_65] : memref<144x100xbf16, #tpu.memory_space<vmem>>, vector<16x100xbf16>
    tpu.vector_store %arg11[%c96, %c0_65], %69 {strides = array<i32>} : memref<144x100xbf16, #tpu.memory_space<vmem>>, vector<16x100xbf16>,
    %c0_66 = arith.constant 0 : index
    %c138_67 = arith.constant 138 : index
    %71 = vector.load %arg10[%c0_66, %c138_67] : memref<16x239xf32, #tpu.memory_space<vmem>>, vector<16x100xf32>
    %72 = arith.truncf %71 : vector<16x100xf32> to vector<16x100xbf16>
    %c112 = arith.constant 112 : index
    %c0_68 = arith.constant 0 : index
    %73 = vector.load %arg11[%c112, %c0_68] : memref<144x100xbf16, #tpu.memory_space<vmem>>, vector<16x100xbf16>
    tpu.vector_store %arg11[%c112, %c0_68], %72 {strides = array<i32>} : memref<144x100xbf16, #tpu.memory_space<vmem>>, vector<16x100xbf16>,
    %c0_69 = arith.constant 0 : index
    %c139_70 = arith.constant 139 : index
    %74 = vector.load %arg10[%c0_69, %c139_70] : memref<16x239xf32, #tpu.memory_space<vmem>>, vector<16x100xf32>
    %75 = arith.truncf %74 : vector<16x100xf32> to vector<16x100xbf16>
    %c128_71 = arith.constant 128 : index
    %c0_72 = arith.constant 0 : index
    %76 = vector.load %arg11[%c128_71, %c0_72] : memref<144x100xbf16, #tpu.memory_space<vmem>>, vector<16x100xbf16>
    tpu.vector_store %arg11[%c128_71, %c0_72], %75 {strides = array<i32>} : memref<144x100xbf16, #tpu.memory_space<vmem>>, vector<16x100xbf16>,
    %c0_73 = arith.constant 0 : index
    %c0_74 = arith.constant 0 : index
    %77 = vector.load %arg6[%c0_73, %c0_74] : memref<16x144xbf16, #tpu.memory_space<vmem>>, vector<16x144xbf16>
    %c0_75 = arith.constant 0 : index
    %c0_76 = arith.constant 0 : index
    %78 = vector.load %arg11[%c0_75, %c0_76] : memref<144x100xbf16, #tpu.memory_space<vmem>>, vector<144x100xbf16>
    %cst_77 = arith.constant dense<0.000000e+00> : vector<16x100xf32>
    %79 = tpu.matmul %77, %78, %cst_77 {dimension_numbers = #tpu.dot_dimension_numbers<[1], [0], [0], [1], [0, 0, 1, 1], [], []>} : vector<16x144xbf16>, vector<144x100xbf16>, vector<16x100xf32> -> vector<16x100xf32>
    %c0_78 = arith.constant 0 : index
    %c0_79 = arith.constant 0 : index
    %80 = vector.load %arg7[%c0_78, %c0_79] : memref<16x1xf32, #tpu.memory_space<vmem>>, vector<16x1xf32>
    %81 = vector.broadcast %80 : vector<16x1xf32> to vector<16x100xf32>
    %82 = arith.mulf %79, %81 : vector<16x100xf32>
    %c0_80 = arith.constant 0 : index
    %c0_81 = arith.constant 0 : index
    %83 = vector.load %arg8[%c0_80, %c0_81] : memref<16x1xf32, #tpu.memory_space<vmem>>, vector<16x1xf32>
    %84 = vector.broadcast %83 : vector<16x1xf32> to vector<16x100xf32>
    %85 = arith.addf %82, %84 : vector<16x100xf32>
    %cst_82 = arith.constant 0.000000e+00 : f32
    %86 = vector.broadcast %cst_82 : f32 to vector<16x100xf32>
    %87 = arith.cmpf oge, %85, %86 : vector<16x100xf32>
    %cst_83 = arith.constant 2.000000e-01 : f32
    %88 = vector.broadcast %cst_83 : f32 to vector<16x100xf32>
    %89 = arith.mulf %88, %85 : vector<16x100xf32>
    %90 = arith.select %87, %85, %89 : vector<16x100xi1>, vector<16x100xf32>
    %91 = vector.broadcast %5 : vector<1x100xf32> to vector<16x100xf32>
    %92 = arith.mulf %90, %91 : vector<16x100xf32>
    %c0_84 = arith.constant 0 : index
    %c128_85 = arith.constant 128 : index
    %93 = vector.load %arg10[%c0_84, %c128_85] : memref<16x239xf32, #tpu.memory_space<vmem>>, vector<16x100xf32>
    tpu.vector_store %arg10[%c0_84, %c128_85], %92 {strides = array<i32>} : memref<16x239xf32, #tpu.memory_space<vmem>>, vector<16x100xf32>,
    %c0_86 = arith.constant 0 : index
    %c128_87 = arith.constant 128 : index
    %94 = vector.load %arg10[%c0_86, %c128_87] : memref<16x239xf32, #tpu.memory_space<vmem>>, vector<16x100xf32>
    %c0_88 = arith.constant 0 : index
    %c0_89 = arith.constant 0 : index
    %c0_90 = arith.constant 0 : index
    %95 = vector.load %arg9[%c0_88, %c0_89, %c0_90] : memref<1x16x100xf32, #tpu.memory_space<vmem>>, vector<1x16x100xf32>
    %96 = vector.shape_cast %95 : vector<1x16x100xf32> to vector<16x100xf32>
    %97 = vector.shape_cast %94 : vector<16x100xf32> to vector<1x16x100xf32>
    tpu.vector_store %arg9[%c0_88, %c0_89, %c0_90], %97 {strides = array<i32>} : memref<1x16x100xf32, #tpu.memory_space<vmem>>, vector<1x16x100xf32>,
    return
  }
  func.func @transform_0(%arg0: i32) -> (i32, i32, i32) {
    %c0_i32 = arith.constant 0 : i32
    %c0_i32_0 = arith.constant 0 : i32
    %c0_i32_1 = arith.constant 0 : i32
    return %arg0, %c0_i32, %c0_i32_0 : i32, i32, i32
  }
  func.func @transform_1(%arg0: i32) -> (i32, i32) {
    %c0_i32 = arith.constant 0 : i32
    %c0_i32_0 = arith.constant 0 : i32
    %c0_i32_1 = arith.constant 0 : i32
    return %c0_i32, %c0_i32_0 : i32, i32
  }
  func.func @transform_2(%arg0: i32) -> (i32, i32) {
    %c0_i32 = arith.constant 0 : i32
    %c0_i32_0 = arith.constant 0 : i32
    %c0_i32_1 = arith.constant 0 : i32
    return %c0_i32, %c0_i32_0 : i32, i32
  }
  func.func @transform_3(%arg0: i32) -> (i32, i32) {
    %c0_i32 = arith.constant 0 : i32
    %c0_i32_0 = arith.constant 0 : i32
    %c0_i32_1 = arith.constant 0 : i32
    return %c0_i32, %c0_i32_0 : i32, i32
  }
  func.func @transform_4(%arg0: i32) -> (i32, i32) {
    %c0_i32 = arith.constant 0 : i32
    %c0_i32_0 = arith.constant 0 : i32
    %c0_i32_1 = arith.constant 0 : i32
    return %c0_i32, %c0_i32_0 : i32, i32
  }
  func.func @transform_5(%arg0: i32) -> (i32, i32) {
    %c0_i32 = arith.constant 0 : i32
    %c0_i32_0 = arith.constant 0 : i32
    %c0_i32_1 = arith.constant 0 : i32
    return %c0_i32, %c0_i32_0 : i32, i32
  }
  func.func @transform_6(%arg0: i32) -> (i32, i32) {
    %c0_i32 = arith.constant 0 : i32
    %c0_i32_0 = arith.constant 0 : i32
    %c0_i32_1 = arith.constant 0 : i32
    return %c0_i32, %c0_i32_0 : i32, i32
  }
  func.func @transform_7(%arg0: i32) -> (i32, i32) {
    %c0_i32 = arith.constant 0 : i32
    %c0_i32_0 = arith.constant 0 : i32
    %c0_i32_1 = arith.constant 0 : i32
    return %c0_i32, %c0_i32_0 : i32, i32
  }
  func.func @transform_8(%arg0: i32) -> (i32, i32, i32) {
    %c0_i32 = arith.constant 0 : i32
    %c0_i32_0 = arith.constant 0 : i32
    %c0_i32_1 = arith.constant 0 : i32
    return %arg0, %c0_i32, %c0_i32_0 : i32, i32, i32
  }
}

module attributes {stable_mosaic.version = 11 : i64} {
  func.func @kernel(%arg0: i32, %arg1: memref<1x16x36xf32, #tpu.memory_space<vmem>>, %arg2: memref<1x36xf32, #tpu.memory_space<vmem>>, %arg3: memref<32x144xbf16, #tpu.memory_space<vmem>>, %arg4: memref<32x1xf32, #tpu.memory_space<vmem>>, %arg5: memref<32x1xf32, #tpu.memory_space<vmem>>, %arg6: memref<32x288xbf16, #tpu.memory_space<vmem>>, %arg7: memref<32x1xf32, #tpu.memory_space<vmem>>, %arg8: memref<32x1xf32, #tpu.memory_space<vmem>>, %arg9: memref<1x32x36xf32, #tpu.memory_space<vmem>>, %arg10: memref<32x171xf32, #tpu.memory_space<vmem>>, %arg11: memref<288x36xbf16, #tpu.memory_space<vmem>>) attributes {dimension_semantics = [#tpu.dimension_semantics<parallel>], iteration_bounds = array<i64: 2>, scalar_prefetch = 0 : i64, scratch_operands = 2 : i64, tpu.core_type = #tpu.core_type<tc>, window_params = [{transform_indices = @transform_0, window_bounds = array<i64: 1, 16, 36>}, {pipeline_mode = #tpu.pipeline_mode<synchronous>, transform_indices = @transform_1, window_bounds = array<i64: 1, 36>}, {pipeline_mode = #tpu.pipeline_mode<synchronous>, transform_indices = @transform_2, window_bounds = array<i64: 32, 144>}, {pipeline_mode = #tpu.pipeline_mode<synchronous>, transform_indices = @transform_3, window_bounds = array<i64: 32, 1>}, {pipeline_mode = #tpu.pipeline_mode<synchronous>, transform_indices = @transform_4, window_bounds = array<i64: 32, 1>}, {pipeline_mode = #tpu.pipeline_mode<synchronous>, transform_indices = @transform_5, window_bounds = array<i64: 32, 288>}, {pipeline_mode = #tpu.pipeline_mode<synchronous>, transform_indices = @transform_6, window_bounds = array<i64: 32, 1>}, {pipeline_mode = #tpu.pipeline_mode<synchronous>, transform_indices = @transform_7, window_bounds = array<i64: 32, 1>}, {transform_indices = @transform_8, window_bounds = array<i64: 1, 32, 36>}]} {
    %cst = arith.constant 0.000000e+00 : f32
    %0 = vector.broadcast %cst : f32 to vector<32x171xf32>
    %c0 = arith.constant 0 : index
    %c0_0 = arith.constant 0 : index
    %1 = vector.load %arg10[%c0, %c0_0] : memref<32x171xf32, #tpu.memory_space<vmem>>, vector<32x171xf32>
    tpu.vector_store %arg10[%c0, %c0_0], %0 {strides = array<i32>} : memref<32x171xf32, #tpu.memory_space<vmem>>, vector<32x171xf32>,
    %c0_1 = arith.constant 0 : index
    %c0_2 = arith.constant 0 : index
    %c0_3 = arith.constant 0 : index
    %2 = vector.load %arg1[%c0_1, %c0_2, %c0_3] : memref<1x16x36xf32, #tpu.memory_space<vmem>>, vector<1x16x36xf32>
    %3 = vector.shape_cast %2 : vector<1x16x36xf32> to vector<16x36xf32>
    %c0_4 = arith.constant 0 : index
    %c128 = arith.constant 128 : index
    %4 = vector.load %arg10[%c0_4, %c128] : memref<32x171xf32, #tpu.memory_space<vmem>>, vector<16x36xf32>
    tpu.vector_store %arg10[%c0_4, %c128], %3 {strides = array<i32>} : memref<32x171xf32, #tpu.memory_space<vmem>>, vector<16x36xf32>,
    %c0_5 = arith.constant 0 : index
    %c0_6 = arith.constant 0 : index
    %5 = vector.load %arg2[%c0_5, %c0_6] : memref<1x36xf32, #tpu.memory_space<vmem>>, vector<1x36xf32>
    %c0_7 = arith.constant 0 : index
    %c121 = arith.constant 121 : index
    %6 = vector.load %arg10[%c0_7, %c121] : memref<32x171xf32, #tpu.memory_space<vmem>>, vector<16x36xf32>
    %7 = arith.truncf %6 : vector<16x36xf32> to vector<16x36xbf16>
    %c0_8 = arith.constant 0 : index
    %c0_9 = arith.constant 0 : index
    %8 = vector.load %arg11[%c0_8, %c0_9] : memref<288x36xbf16, #tpu.memory_space<vmem>>, vector<16x36xbf16>
    tpu.vector_store %arg11[%c0_8, %c0_9], %7 {strides = array<i32>} : memref<288x36xbf16, #tpu.memory_space<vmem>>, vector<16x36xbf16>,
    %c0_10 = arith.constant 0 : index
    %c122 = arith.constant 122 : index
    %9 = vector.load %arg10[%c0_10, %c122] : memref<32x171xf32, #tpu.memory_space<vmem>>, vector<16x36xf32>
    %10 = arith.truncf %9 : vector<16x36xf32> to vector<16x36xbf16>
    %c16 = arith.constant 16 : index
    %c0_11 = arith.constant 0 : index
    %11 = vector.load %arg11[%c16, %c0_11] : memref<288x36xbf16, #tpu.memory_space<vmem>>, vector<16x36xbf16>
    tpu.vector_store %arg11[%c16, %c0_11], %10 {strides = array<i32>} : memref<288x36xbf16, #tpu.memory_space<vmem>>, vector<16x36xbf16>,
    %c0_12 = arith.constant 0 : index
    %c123 = arith.constant 123 : index
    %12 = vector.load %arg10[%c0_12, %c123] : memref<32x171xf32, #tpu.memory_space<vmem>>, vector<16x36xf32>
    %13 = arith.truncf %12 : vector<16x36xf32> to vector<16x36xbf16>
    %c32 = arith.constant 32 : index
    %c0_13 = arith.constant 0 : index
    %14 = vector.load %arg11[%c32, %c0_13] : memref<288x36xbf16, #tpu.memory_space<vmem>>, vector<16x36xbf16>
    tpu.vector_store %arg11[%c32, %c0_13], %13 {strides = array<i32>} : memref<288x36xbf16, #tpu.memory_space<vmem>>, vector<16x36xbf16>,
    %c0_14 = arith.constant 0 : index
    %c127 = arith.constant 127 : index
    %15 = vector.load %arg10[%c0_14, %c127] : memref<32x171xf32, #tpu.memory_space<vmem>>, vector<16x36xf32>
    %16 = arith.truncf %15 : vector<16x36xf32> to vector<16x36xbf16>
    %c48 = arith.constant 48 : index
    %c0_15 = arith.constant 0 : index
    %17 = vector.load %arg11[%c48, %c0_15] : memref<288x36xbf16, #tpu.memory_space<vmem>>, vector<16x36xbf16>
    tpu.vector_store %arg11[%c48, %c0_15], %16 {strides = array<i32>} : memref<288x36xbf16, #tpu.memory_space<vmem>>, vector<16x36xbf16>,
    %c0_16 = arith.constant 0 : index
    %c128_17 = arith.constant 128 : index
    %18 = vector.load %arg10[%c0_16, %c128_17] : memref<32x171xf32, #tpu.memory_space<vmem>>, vector<16x36xf32>
    %19 = arith.truncf %18 : vector<16x36xf32> to vector<16x36xbf16>
    %c64 = arith.constant 64 : index
    %c0_18 = arith.constant 0 : index
    %20 = vector.load %arg11[%c64, %c0_18] : memref<288x36xbf16, #tpu.memory_space<vmem>>, vector<16x36xbf16>
    tpu.vector_store %arg11[%c64, %c0_18], %19 {strides = array<i32>} : memref<288x36xbf16, #tpu.memory_space<vmem>>, vector<16x36xbf16>,
    %c0_19 = arith.constant 0 : index
    %c129 = arith.constant 129 : index
    %21 = vector.load %arg10[%c0_19, %c129] : memref<32x171xf32, #tpu.memory_space<vmem>>, vector<16x36xf32>
    %22 = arith.truncf %21 : vector<16x36xf32> to vector<16x36xbf16>
    %c80 = arith.constant 80 : index
    %c0_20 = arith.constant 0 : index
    %23 = vector.load %arg11[%c80, %c0_20] : memref<288x36xbf16, #tpu.memory_space<vmem>>, vector<16x36xbf16>
    tpu.vector_store %arg11[%c80, %c0_20], %22 {strides = array<i32>} : memref<288x36xbf16, #tpu.memory_space<vmem>>, vector<16x36xbf16>,
    %c0_21 = arith.constant 0 : index
    %c133 = arith.constant 133 : index
    %24 = vector.load %arg10[%c0_21, %c133] : memref<32x171xf32, #tpu.memory_space<vmem>>, vector<16x36xf32>
    %25 = arith.truncf %24 : vector<16x36xf32> to vector<16x36xbf16>
    %c96 = arith.constant 96 : index
    %c0_22 = arith.constant 0 : index
    %26 = vector.load %arg11[%c96, %c0_22] : memref<288x36xbf16, #tpu.memory_space<vmem>>, vector<16x36xbf16>
    tpu.vector_store %arg11[%c96, %c0_22], %25 {strides = array<i32>} : memref<288x36xbf16, #tpu.memory_space<vmem>>, vector<16x36xbf16>,
    %c0_23 = arith.constant 0 : index
    %c134 = arith.constant 134 : index
    %27 = vector.load %arg10[%c0_23, %c134] : memref<32x171xf32, #tpu.memory_space<vmem>>, vector<16x36xf32>
    %28 = arith.truncf %27 : vector<16x36xf32> to vector<16x36xbf16>
    %c112 = arith.constant 112 : index
    %c0_24 = arith.constant 0 : index
    %29 = vector.load %arg11[%c112, %c0_24] : memref<288x36xbf16, #tpu.memory_space<vmem>>, vector<16x36xbf16>
    tpu.vector_store %arg11[%c112, %c0_24], %28 {strides = array<i32>} : memref<288x36xbf16, #tpu.memory_space<vmem>>, vector<16x36xbf16>,
    %c0_25 = arith.constant 0 : index
    %c135 = arith.constant 135 : index
    %30 = vector.load %arg10[%c0_25, %c135] : memref<32x171xf32, #tpu.memory_space<vmem>>, vector<16x36xf32>
    %31 = arith.truncf %30 : vector<16x36xf32> to vector<16x36xbf16>
    %c128_26 = arith.constant 128 : index
    %c0_27 = arith.constant 0 : index
    %32 = vector.load %arg11[%c128_26, %c0_27] : memref<288x36xbf16, #tpu.memory_space<vmem>>, vector<16x36xbf16>
    tpu.vector_store %arg11[%c128_26, %c0_27], %31 {strides = array<i32>} : memref<288x36xbf16, #tpu.memory_space<vmem>>, vector<16x36xbf16>,
    %c0_28 = arith.constant 0 : index
    %c0_29 = arith.constant 0 : index
    %33 = vector.load %arg3[%c0_28, %c0_29] : memref<32x144xbf16, #tpu.memory_space<vmem>>, vector<32x144xbf16>
    %c0_30 = arith.constant 0 : index
    %c0_31 = arith.constant 0 : index
    %34 = vector.load %arg11[%c0_30, %c0_31] : memref<288x36xbf16, #tpu.memory_space<vmem>>, vector<144x36xbf16>
    %cst_32 = arith.constant dense<0.000000e+00> : vector<32x36xf32>
    %35 = tpu.matmul %33, %34, %cst_32 {dimension_numbers = #tpu.dot_dimension_numbers<[1], [0], [0], [1], [0, 0, 1, 1], [], []>} : vector<32x144xbf16>, vector<144x36xbf16>, vector<32x36xf32> -> vector<32x36xf32>
    %c0_33 = arith.constant 0 : index
    %c0_34 = arith.constant 0 : index
    %36 = vector.load %arg4[%c0_33, %c0_34] : memref<32x1xf32, #tpu.memory_space<vmem>>, vector<32x1xf32>
    %37 = vector.broadcast %36 : vector<32x1xf32> to vector<32x36xf32>
    %38 = arith.mulf %35, %37 : vector<32x36xf32>
    %c0_35 = arith.constant 0 : index
    %c0_36 = arith.constant 0 : index
    %39 = vector.load %arg5[%c0_35, %c0_36] : memref<32x1xf32, #tpu.memory_space<vmem>>, vector<32x1xf32>
    %40 = vector.broadcast %39 : vector<32x1xf32> to vector<32x36xf32>
    %41 = arith.addf %38, %40 : vector<32x36xf32>
    %cst_37 = arith.constant 0.000000e+00 : f32
    %42 = vector.broadcast %cst_37 : f32 to vector<32x36xf32>
    %43 = arith.cmpf oge, %41, %42 : vector<32x36xf32>
    %cst_38 = arith.constant 2.000000e-01 : f32
    %44 = vector.broadcast %cst_38 : f32 to vector<32x36xf32>
    %45 = arith.mulf %44, %41 : vector<32x36xf32>
    %46 = arith.select %43, %41, %45 : vector<32x36xi1>, vector<32x36xf32>
    %47 = vector.broadcast %5 : vector<1x36xf32> to vector<32x36xf32>
    %48 = arith.mulf %46, %47 : vector<32x36xf32>
    %c0_39 = arith.constant 0 : index
    %c128_40 = arith.constant 128 : index
    %49 = vector.load %arg10[%c0_39, %c128_40] : memref<32x171xf32, #tpu.memory_space<vmem>>, vector<32x36xf32>
    tpu.vector_store %arg10[%c0_39, %c128_40], %48 {strides = array<i32>} : memref<32x171xf32, #tpu.memory_space<vmem>>, vector<32x36xf32>,
    %c0_41 = arith.constant 0 : index
    %c121_42 = arith.constant 121 : index
    %50 = vector.load %arg10[%c0_41, %c121_42] : memref<32x171xf32, #tpu.memory_space<vmem>>, vector<32x36xf32>
    %51 = arith.truncf %50 : vector<32x36xf32> to vector<32x36xbf16>
    %c0_43 = arith.constant 0 : index
    %c0_44 = arith.constant 0 : index
    %52 = vector.load %arg11[%c0_43, %c0_44] : memref<288x36xbf16, #tpu.memory_space<vmem>>, vector<32x36xbf16>
    tpu.vector_store %arg11[%c0_43, %c0_44], %51 {strides = array<i32>} : memref<288x36xbf16, #tpu.memory_space<vmem>>, vector<32x36xbf16>,
    %c0_45 = arith.constant 0 : index
    %c122_46 = arith.constant 122 : index
    %53 = vector.load %arg10[%c0_45, %c122_46] : memref<32x171xf32, #tpu.memory_space<vmem>>, vector<32x36xf32>
    %54 = arith.truncf %53 : vector<32x36xf32> to vector<32x36xbf16>
    %c32_47 = arith.constant 32 : index
    %c0_48 = arith.constant 0 : index
    %55 = vector.load %arg11[%c32_47, %c0_48] : memref<288x36xbf16, #tpu.memory_space<vmem>>, vector<32x36xbf16>
    tpu.vector_store %arg11[%c32_47, %c0_48], %54 {strides = array<i32>} : memref<288x36xbf16, #tpu.memory_space<vmem>>, vector<32x36xbf16>,
    %c0_49 = arith.constant 0 : index
    %c123_50 = arith.constant 123 : index
    %56 = vector.load %arg10[%c0_49, %c123_50] : memref<32x171xf32, #tpu.memory_space<vmem>>, vector<32x36xf32>
    %57 = arith.truncf %56 : vector<32x36xf32> to vector<32x36xbf16>
    %c64_51 = arith.constant 64 : index
    %c0_52 = arith.constant 0 : index
    %58 = vector.load %arg11[%c64_51, %c0_52] : memref<288x36xbf16, #tpu.memory_space<vmem>>, vector<32x36xbf16>
    tpu.vector_store %arg11[%c64_51, %c0_52], %57 {strides = array<i32>} : memref<288x36xbf16, #tpu.memory_space<vmem>>, vector<32x36xbf16>,
    %c0_53 = arith.constant 0 : index
    %c127_54 = arith.constant 127 : index
    %59 = vector.load %arg10[%c0_53, %c127_54] : memref<32x171xf32, #tpu.memory_space<vmem>>, vector<32x36xf32>
    %60 = arith.truncf %59 : vector<32x36xf32> to vector<32x36xbf16>
    %c96_55 = arith.constant 96 : index
    %c0_56 = arith.constant 0 : index
    %61 = vector.load %arg11[%c96_55, %c0_56] : memref<288x36xbf16, #tpu.memory_space<vmem>>, vector<32x36xbf16>
    tpu.vector_store %arg11[%c96_55, %c0_56], %60 {strides = array<i32>} : memref<288x36xbf16, #tpu.memory_space<vmem>>, vector<32x36xbf16>,
    %c0_57 = arith.constant 0 : index
    %c128_58 = arith.constant 128 : index
    %62 = vector.load %arg10[%c0_57, %c128_58] : memref<32x171xf32, #tpu.memory_space<vmem>>, vector<32x36xf32>
    %63 = arith.truncf %62 : vector<32x36xf32> to vector<32x36xbf16>
    %c128_59 = arith.constant 128 : index
    %c0_60 = arith.constant 0 : index
    %64 = vector.load %arg11[%c128_59, %c0_60] : memref<288x36xbf16, #tpu.memory_space<vmem>>, vector<32x36xbf16>
    tpu.vector_store %arg11[%c128_59, %c0_60], %63 {strides = array<i32>} : memref<288x36xbf16, #tpu.memory_space<vmem>>, vector<32x36xbf16>,
    %c0_61 = arith.constant 0 : index
    %c129_62 = arith.constant 129 : index
    %65 = vector.load %arg10[%c0_61, %c129_62] : memref<32x171xf32, #tpu.memory_space<vmem>>, vector<32x36xf32>
    %66 = arith.truncf %65 : vector<32x36xf32> to vector<32x36xbf16>
    %c160 = arith.constant 160 : index
    %c0_63 = arith.constant 0 : index
    %67 = vector.load %arg11[%c160, %c0_63] : memref<288x36xbf16, #tpu.memory_space<vmem>>, vector<32x36xbf16>
    tpu.vector_store %arg11[%c160, %c0_63], %66 {strides = array<i32>} : memref<288x36xbf16, #tpu.memory_space<vmem>>, vector<32x36xbf16>,
    %c0_64 = arith.constant 0 : index
    %c133_65 = arith.constant 133 : index
    %68 = vector.load %arg10[%c0_64, %c133_65] : memref<32x171xf32, #tpu.memory_space<vmem>>, vector<32x36xf32>
    %69 = arith.truncf %68 : vector<32x36xf32> to vector<32x36xbf16>
    %c192 = arith.constant 192 : index
    %c0_66 = arith.constant 0 : index
    %70 = vector.load %arg11[%c192, %c0_66] : memref<288x36xbf16, #tpu.memory_space<vmem>>, vector<32x36xbf16>
    tpu.vector_store %arg11[%c192, %c0_66], %69 {strides = array<i32>} : memref<288x36xbf16, #tpu.memory_space<vmem>>, vector<32x36xbf16>,
    %c0_67 = arith.constant 0 : index
    %c134_68 = arith.constant 134 : index
    %71 = vector.load %arg10[%c0_67, %c134_68] : memref<32x171xf32, #tpu.memory_space<vmem>>, vector<32x36xf32>
    %72 = arith.truncf %71 : vector<32x36xf32> to vector<32x36xbf16>
    %c224 = arith.constant 224 : index
    %c0_69 = arith.constant 0 : index
    %73 = vector.load %arg11[%c224, %c0_69] : memref<288x36xbf16, #tpu.memory_space<vmem>>, vector<32x36xbf16>
    tpu.vector_store %arg11[%c224, %c0_69], %72 {strides = array<i32>} : memref<288x36xbf16, #tpu.memory_space<vmem>>, vector<32x36xbf16>,
    %c0_70 = arith.constant 0 : index
    %c135_71 = arith.constant 135 : index
    %74 = vector.load %arg10[%c0_70, %c135_71] : memref<32x171xf32, #tpu.memory_space<vmem>>, vector<32x36xf32>
    %75 = arith.truncf %74 : vector<32x36xf32> to vector<32x36xbf16>
    %c256 = arith.constant 256 : index
    %c0_72 = arith.constant 0 : index
    %76 = vector.load %arg11[%c256, %c0_72] : memref<288x36xbf16, #tpu.memory_space<vmem>>, vector<32x36xbf16>
    tpu.vector_store %arg11[%c256, %c0_72], %75 {strides = array<i32>} : memref<288x36xbf16, #tpu.memory_space<vmem>>, vector<32x36xbf16>,
    %c0_73 = arith.constant 0 : index
    %c0_74 = arith.constant 0 : index
    %77 = vector.load %arg6[%c0_73, %c0_74] : memref<32x288xbf16, #tpu.memory_space<vmem>>, vector<32x288xbf16>
    %c0_75 = arith.constant 0 : index
    %c0_76 = arith.constant 0 : index
    %78 = vector.load %arg11[%c0_75, %c0_76] : memref<288x36xbf16, #tpu.memory_space<vmem>>, vector<288x36xbf16>
    %cst_77 = arith.constant dense<0.000000e+00> : vector<32x36xf32>
    %79 = tpu.matmul %77, %78, %cst_77 {dimension_numbers = #tpu.dot_dimension_numbers<[1], [0], [0], [1], [0, 0, 1, 1], [], []>} : vector<32x288xbf16>, vector<288x36xbf16>, vector<32x36xf32> -> vector<32x36xf32>
    %c0_78 = arith.constant 0 : index
    %c0_79 = arith.constant 0 : index
    %80 = vector.load %arg7[%c0_78, %c0_79] : memref<32x1xf32, #tpu.memory_space<vmem>>, vector<32x1xf32>
    %81 = vector.broadcast %80 : vector<32x1xf32> to vector<32x36xf32>
    %82 = arith.mulf %79, %81 : vector<32x36xf32>
    %c0_80 = arith.constant 0 : index
    %c0_81 = arith.constant 0 : index
    %83 = vector.load %arg8[%c0_80, %c0_81] : memref<32x1xf32, #tpu.memory_space<vmem>>, vector<32x1xf32>
    %84 = vector.broadcast %83 : vector<32x1xf32> to vector<32x36xf32>
    %85 = arith.addf %82, %84 : vector<32x36xf32>
    %cst_82 = arith.constant 0.000000e+00 : f32
    %86 = vector.broadcast %cst_82 : f32 to vector<32x36xf32>
    %87 = arith.cmpf oge, %85, %86 : vector<32x36xf32>
    %cst_83 = arith.constant 2.000000e-01 : f32
    %88 = vector.broadcast %cst_83 : f32 to vector<32x36xf32>
    %89 = arith.mulf %88, %85 : vector<32x36xf32>
    %90 = arith.select %87, %85, %89 : vector<32x36xi1>, vector<32x36xf32>
    %91 = vector.broadcast %5 : vector<1x36xf32> to vector<32x36xf32>
    %92 = arith.mulf %90, %91 : vector<32x36xf32>
    %c0_84 = arith.constant 0 : index
    %c128_85 = arith.constant 128 : index
    %93 = vector.load %arg10[%c0_84, %c128_85] : memref<32x171xf32, #tpu.memory_space<vmem>>, vector<32x36xf32>
    tpu.vector_store %arg10[%c0_84, %c128_85], %92 {strides = array<i32>} : memref<32x171xf32, #tpu.memory_space<vmem>>, vector<32x36xf32>,
    %c0_86 = arith.constant 0 : index
    %c128_87 = arith.constant 128 : index
    %94 = vector.load %arg10[%c0_86, %c128_87] : memref<32x171xf32, #tpu.memory_space<vmem>>, vector<32x36xf32>
    %c0_88 = arith.constant 0 : index
    %c0_89 = arith.constant 0 : index
    %c0_90 = arith.constant 0 : index
    %95 = vector.load %arg9[%c0_88, %c0_89, %c0_90] : memref<1x32x36xf32, #tpu.memory_space<vmem>>, vector<1x32x36xf32>
    %96 = vector.shape_cast %95 : vector<1x32x36xf32> to vector<32x36xf32>
    %97 = vector.shape_cast %94 : vector<32x36xf32> to vector<1x32x36xf32>
    tpu.vector_store %arg9[%c0_88, %c0_89, %c0_90], %97 {strides = array<i32>} : memref<1x32x36xf32, #tpu.memory_space<vmem>>, vector<1x32x36xf32>,
    return
  }
  func.func @transform_0(%arg0: i32) -> (i32, i32, i32) {
    %c0_i32 = arith.constant 0 : i32
    %c0_i32_0 = arith.constant 0 : i32
    %c0_i32_1 = arith.constant 0 : i32
    return %arg0, %c0_i32, %c0_i32_0 : i32, i32, i32
  }
  func.func @transform_1(%arg0: i32) -> (i32, i32) {
    %c0_i32 = arith.constant 0 : i32
    %c0_i32_0 = arith.constant 0 : i32
    %c0_i32_1 = arith.constant 0 : i32
    return %c0_i32, %c0_i32_0 : i32, i32
  }
  func.func @transform_2(%arg0: i32) -> (i32, i32) {
    %c0_i32 = arith.constant 0 : i32
    %c0_i32_0 = arith.constant 0 : i32
    %c0_i32_1 = arith.constant 0 : i32
    return %c0_i32, %c0_i32_0 : i32, i32
  }
  func.func @transform_3(%arg0: i32) -> (i32, i32) {
    %c0_i32 = arith.constant 0 : i32
    %c0_i32_0 = arith.constant 0 : i32
    %c0_i32_1 = arith.constant 0 : i32
    return %c0_i32, %c0_i32_0 : i32, i32
  }
  func.func @transform_4(%arg0: i32) -> (i32, i32) {
    %c0_i32 = arith.constant 0 : i32
    %c0_i32_0 = arith.constant 0 : i32
    %c0_i32_1 = arith.constant 0 : i32
    return %c0_i32, %c0_i32_0 : i32, i32
  }
  func.func @transform_5(%arg0: i32) -> (i32, i32) {
    %c0_i32 = arith.constant 0 : i32
    %c0_i32_0 = arith.constant 0 : i32
    %c0_i32_1 = arith.constant 0 : i32
    return %c0_i32, %c0_i32_0 : i32, i32
  }
  func.func @transform_6(%arg0: i32) -> (i32, i32) {
    %c0_i32 = arith.constant 0 : i32
    %c0_i32_0 = arith.constant 0 : i32
    %c0_i32_1 = arith.constant 0 : i32
    return %c0_i32, %c0_i32_0 : i32, i32
  }
  func.func @transform_7(%arg0: i32) -> (i32, i32) {
    %c0_i32 = arith.constant 0 : i32
    %c0_i32_0 = arith.constant 0 : i32
    %c0_i32_1 = arith.constant 0 : i32
    return %c0_i32, %c0_i32_0 : i32, i32
  }
  func.func @transform_8(%arg0: i32) -> (i32, i32, i32) {
    %c0_i32 = arith.constant 0 : i32
    %c0_i32_0 = arith.constant 0 : i32
    %c0_i32_1 = arith.constant 0 : i32
    return %arg0, %c0_i32, %c0_i32_0 : i32, i32, i32
  }
}

</mosaic_0001>

<bundles_post_ra>
// kernel: image_encoder_forward.3
= control target key start
LH: loop header
LB: loop body
LE: loop exit
PB: predicated region body
PF: predicated region fallthrough
CT: control target
= control target key end

     0   :  { %s1588_s27 = smov 0   ;;  %s1786_s0 = inlined_call_operand.vmem [shape: f32[2,8,324], index: 0, kind: input, shape index: {}]   ;;  %s1787_s1 = inlined_call_operand.vmem [shape: f32[1,324], index: 1, kind: input, shape index: {}]   ;;  %s1788_s2 = inlined_call_operand.vmem [shape: bf16[8,72], index: 2, kind: input, shape index: {}]   ;;  %s1789_s3 = inlined_call_operand.vmem [shape: f32[8,1], index: 3, kind: input, shape index: {}]   ;;  %s1790_s4 = inlined_call_operand.vmem [shape: f32[8,1], index: 4, kind: input, shape index: {}]   ;;  %s1791_s5 = inlined_call_operand.vmem [shape: bf16[8,72], index: 5, kind: input, shape index: {}]   ;;  %s1792_s6 = inlined_call_operand.vmem [shape: f32[8,1], index: 6, kind: input, shape index: {}]   ;;  %s1793_s7 = inlined_call_operand.vmem [shape: f32[8,1], index: 7, kind: input, shape index: {}]   ;;  %s1794_s8 = inlined_call_operand.vmem [shape: f32[2,8,324], index: 8, kind: output, shape index: {}]  }
   0x1 LB: > { %s1335_s28 = sadd.s32 4294967295, %s1530_s27   ;;  %p1339_p0 = scmp.ge.s32.totalorder %s1530_s27, 1  ;;  %s1530_s27 = sphi %s1588_s27, %s18_s27  }
   0x2   : > { %p262_p1 = scmp.lt.s32.totalorder %s1530_s27, 3 }
   0x4   : > { %p263_p2 = pnand %p1339_p0, %p262_p1 }
   0x5   : > { %p296_p3 = scmp.lt.s32.totalorder (!%p263_p2), %s1335_s28, 1  ;;  %vm310_vm0 = vcmask (!%p263_p2), 711680   ;;  %v1532_v0 = vmov (!%p263_p2), 0.0   ;;  %vm317_vm1 = vcmask (!%p263_p2), 556032   ;;  %s1533_s11 = smov (!%p263_p2), 18   ;;  %vm352_vm2 = vcmask (!%p263_p2), 551936  }
   0x6   : > { %266 = sbr.rel (%p263_p2) target bundleno = 797 (0x31d), region = 52  ;;  %311 = vst.msk [vmem:[#allocation2 + $0x18] sm:$0xff] (!%p263_p2), %vm310_vm0, %v1532_v0  ;;  %1464 = vmatprep.subr.bf16.mxu1 (!%p263_p2), %v1532_v0  ;;  %s1534_s12 = smov (!%p263_p2), 19   ;;  %v1540_v9 = vmov (!%p263_p2), 0   ;;  %vm1541_vm3 = vmmov (!%p263_p2), 0   ;;  %v762_v10 = vld [vmem:[%s1789_s3] sm:$0xff] (!%p263_p2) }
   0x7   : > { %s1535_s13 = smov (!%p263_p2), 17   ;;  %s1536_s14 = smov (!%p263_p2), 1   ;;  %713 = vmatprep.mubr.bf16.mxu0 (!%p263_p2), %v1540_v9  ;;  %1512 = vset.pattern.permute.xlu0 (!%p263_p2), %v1540_v9  ;;  %v771_v11 = vld [vmem:[%s1790_s4] sm:$0xff] (!%p263_p2)  ;;  %vm344_vm4 = vcmask (!%p263_p2), 1043456   ;;  %vm379_vm5 = vcmask (!%p263_p2), 146432   ;;  %vm346_vm6 = vcmask (!%p263_p2), 154624  }
   0x8   : > { %s1537_s15 = smov (!%p263_p2), 127   ;;  %s1538_s16 = smov (!%p263_p2), 111   ;;  %1474 = vmatprep.mubr.msk.bf16.mxu1 (!%p263_p2), %vm1541_vm3, %v1532_v0  ;;  %1513 = vset.pattern.permute.xlu1 (!%p263_p2), %v1540_v9  ;;  %vm411_vm7 = vcmask (!%p263_p2), 138240   ;;  %vm443_vm8 = vcmask (!%p263_p2), 7168   ;;  %vm489_vm9 = vcmask (!%p263_p2), 1039360   ;;  %vm516_vm10 = vcmask (!%p263_p2), 908288  }
   0x9   : > { %s1539_s17 = smov (!%p263_p2), 110   ;;  %s1542_s18 = smov (!%p263_p2), 109   ;;  %vm543_vm11 = vcmask (!%p263_p2), 900096   ;;  %vm570_vm12 = vcmask (!%p263_p2), 891904   ;;  %vm667_vm13 = vcmask (!%p263_p2), 588800  }
   0xd   : > { %s1796_s28 = smov (!%p296_p3, %s1335_s28), 1 }
   0xe   : > { %s1492_s29 = smul.u32 24, %s1796_s28 }
  0x10   : > { %s300_s10 = scalar_lea.vmem %s1786_s0, %s1492_s29 }
  0x11   : > { %v312_v1 = vld [vmem:[%s300_s10] sm:$0xff]  ;;  %v314_v2 = vld [vmem:[%s300_s10 + $0x10] sm:$0xff]  ;;  %v313_v4 = vld [vmem:[%s300_s10 + $0x8] sm:$0xff] }
  0x12   : > { %v1418_v3 = vpack.c.bf16 %v312_v1, %v1532_v0  ;;  %318 = vst.msk [vmem:[#allocation2 + $0x18] sm:$0xff] %vm317_vm1, %v314_v2  ;;  %v1617_v8 = vpack.c.bf16 %v313_v4, %v312_v1 }
  0x14   : > { %372 = vrot.lane.b32.xlu1 %v1418_v3, %s1533_s11  ;;  %338 = vrot.lane.b32.xlu0 %v1418_v3, %s1534_s12 }
  0x19   : > { %v357_v5 = vld [vmem:[#allocation2 + $0x18] sm:$0xff] }
  0x1a   : > { %v1419_v6 = vpack.c.bf16 %v357_v5, %v313_v4  ;;  %v1427_v7 = vpack.c.bf16 %v357_v5, %v357_v5 }
  0x1c   : > { %374 = vrot.lane.b32.xlu1 %v1419_v6, %s1533_s11  ;;  %340 = vrot.lane.b32.xlu0 %v1419_v6, %s1534_s12  ;;  %467 = vst.msk [vmem:[#allocation3 + $0x38] sm:$0xf] %vm352_vm2, %v1427_v7 }
  0x20   : > { %406 = vrot.lane.b32.xlu1 %v1419_v6, %s1535_s13  ;;  %404 = vrot.lane.b32.xlu0 %v1418_v3, %s1535_s13 }
  0x24   : > { %438 = vrot.lane.b32.xlu1 %v1419_v6, %s1536_s14  ;;  %436 = vrot.lane.b32.xlu0 %v1418_v3, %s1536_s14 }
  0x28   : > { %484 = vrot.lane.b32.xlu1 %v1427_v7, %s1537_s15  ;;  %482 = vrot.lane.b32.xlu0 %v1617_v8, %s1537_s15 }
  0x2c   : > { %511 = vrot.lane.b32.xlu1 %v1427_v7, %s1538_s16  ;;  %509 = vrot.lane.b32.xlu0 %v1617_v8, %s1538_s16 }
  0x30   : > { %538 = vrot.lane.b32.xlu1 %v1427_v7, %s1539_s17  ;;  %536 = vrot.lane.b32.xlu0 %v1617_v8, %s1539_s17 }
  0x34   : > { %565 = vrot.lane.b32.xlu1 %v1427_v7, %s1542_s18  ;;  %563 = vrot.lane.b32.xlu0 %v1617_v8, %s1542_s18 }
  0x38   : > { %765 = vperm.xlu0 %1512, %v762_v10   ;;  %774 = vperm.xlu1 %1513, %v771_v11  }
  0x86   : > { %v373_v12 = vpop.permute.xlu1 %372  ;;  %v339_v13 = vpop.permute.xlu0 %338 }
  0x87   : > { %v342_v14 = vrot.slane %v339_v13, 4  ;;  %v376_v17 = vrot.slane %v373_v12, 4 }
  0x8e   : > { %v375_v15 = vpop.permute.xlu1 %374  ;;  %v341_v16 = vpop.permute.xlu0 %340 }
  0x8f   : > { %v377_v18 = vrot.slane %v375_v15, 4  ;;  %v343_v19 = vrot.slane %v341_v16, 4 }
  0x91   : > { %v378_v20 = vsel %vm344_vm4, %v376_v17, %v377_v18  ;;  %v381_v21 = vsel %vm379_vm5, %v375_v15, %v377_v18  ;;  %v345_v22 = vsel %vm344_vm4, %v342_v14, %v343_v19  ;;  %v348_v23 = vsel %vm346_vm6, %v341_v16, %v343_v19  ;;  %v576_v16 = vld [vmem:[%s1788_s2] sm:$0xf] }
  0x92   : > { %v380_v24 = vsel %vm379_vm5, %v373_v12, %v378_v20  ;;  %385 = vst.msk [vmem:[#allocation3 + $0x14] sm:$0xf] %vm352_vm2, %v381_v21  ;;  %v347_v25 = vsel %vm346_vm6, %v339_v13, %v345_v22  ;;  %353 = vst.msk [vmem:[#allocation3 + $0x8] sm:$0xf] %vm352_vm2, %v348_v23  ;;  %v407_v26 = vpop.permute.xlu1 %406  ;;  %v405_v27 = vpop.permute.xlu0 %404  ;;  %v790_v20 = vlaneseq }
  0x93   : > { %v409_v28 = vrot.slane %v407_v26, 4  ;;  %v408_v29 = vrot.slane %v405_v27, 4  ;;  %v1361_v30 = vcombine.high %v347_v25, %v380_v24  ;;  %v1360_v31 = vcombine.low %v347_v25, %v380_v24 }
  0x94   : > { %v791_v21 = vshrl.u32 %v790_v20, 7 }
  0x95   : > { %v413_v32 = vsel %vm411_vm7, %v407_v26, %v409_v28  ;;  %681 = vmatprep.subr.bf16.mxu0 %v1361_v30  ;;  %v410_v35 = vsel %vm344_vm4, %v408_v29, %v409_v28  ;;  %v319_v26 = vld [vmem:[%s1787_s1] sm:$0x7] }
  0x96   : > { %417 = vst.msk [vmem:[#allocation3 + $0x20] sm:$0xf] %vm352_vm2, %v413_v32  ;;  %v439_v33 = vpop.permute.xlu1 %438  ;;  %v437_v34 = vpop.permute.xlu0 %436  ;;  %682 = vmatpush1.bf16.msra.mxu0 %v1360_v31  ;;  %v412_v41 = vsel %vm411_vm7, %v405_v27, %v410_v35  ;;  %v792_v25 = vsub.s32 0, %v791_v21  ;;  %v796_v29 = vsub.s32 1, %v791_v21  ;;  %v800_v32 = vsub.s32 2, %v791_v21 }
  0x97   : > { %v441_v36 = vrot.slane %v439_v33, 4  ;;  %v440_v37 = vrot.slane %v437_v34, 4 }
  0x99   : > { %v445_v38 = vsel %vm443_vm8, %v439_v33, %v441_v36  ;;  %v442_v39 = vsel %vm344_vm4, %v440_v37, %v441_v36  ;;  %v1514_v40 = vld [vmem:[#allocation3 + $0x8] ss:$12 sps:$4 sm:$0xff]   ;;  %v1691_v37 = vrot.slane %v319_v26, %v792_v25 }
  0x9a   : > { %449 = vst.msk [vmem:[#allocation3 + $0x2c] sm:$0xf] %vm352_vm2, %v445_v38  ;;  %v444_v42 = vsel %vm443_vm8, %v437_v34, %v442_v39  ;;  %v485_v43 = vpop.permute.xlu1 %484  ;;  %v483_v44 = vpop.permute.xlu0 %482  ;;  %1465 = vmatpush3.bf16.msra.mxu1 %v1514_v40 }
  0x9b   : > { %v487_v45 = vrot.slane %v485_v43, 4  ;;  %494 = vst.msk [vmem:[#allocation3 + $0x44] sm:$0xf] %vm352_vm2, %v485_v43  ;;  %v486_v46 = vrot.slane %v483_v44, 4  ;;  %v1364_v47 = vcombine.high %v412_v41, %v444_v42  ;;  %v1363_v48 = vcombine.low %v412_v41, %v444_v42  ;;  %1466 = vmatprep.subr.bf16.mxu1 %v1532_v0 }
  0x9c   : > { %v1693_v41 = vrot.slane %v319_v26, %v796_v29 }
  0x9d   : > { %v488_v49 = vsel %vm344_vm4, %v486_v46, %v487_v45  ;;  %683 = vmatprep.subr.bf16.mxu0 %v1364_v47  ;;  %v1695_v45 = vrot.slane %v319_v26, %v800_v32 }
  0x9e   : > { %v490_v50 = vsel %vm489_vm9, %v483_v44, %v488_v49  ;;  %v512_v51 = vpop.permute.xlu1 %511  ;;  %v510_v52 = vpop.permute.xlu0 %509  ;;  %684 = vmatpush1.bf16.msra.mxu0 %v1363_v48 }
  0x9f   : > { %v514_v53 = vrot.slane %v512_v51, 4  ;;  %521 = vst.msk [vmem:[#allocation3 + $0x50] sm:$0xf] %vm352_vm2, %v512_v51  ;;  %v513_v54 = vrot.slane %v510_v52, 4  ;;  %v1367_v55 = vcombine.high %v1617_v8, %v490_v50  ;;  %v1366_v56 = vcombine.low %v1617_v8, %v490_v50 }
  0xa1   : > { %v1515_v57 = vld [vmem:[#allocation3 + $0x20] ss:$12 sps:$4 sm:$0xff]   ;;  %685 = vmatprep.subr.bf16.mxu0 %v1367_v55  ;;  %v515_v60 = vsel %vm344_vm4, %v513_v54, %v514_v53 }
  0xa2   : > { %v539_v58 = vpop.permute.xlu1 %538  ;;  %v537_v59 = vpop.permute.xlu0 %536  ;;  %686 = vmatpush1.bf16.msra.mxu0 %v1366_v56  ;;  %1467 = vmatpush3.bf16.msra.mxu1 %v1515_v57  ;;  %v1516_v1 = vld [vmem:[#allocation3 + $0x38] ss:$12 sps:$4 sm:$0xff]   ;;  %v517_v2 = vsel %vm516_vm10, %v510_v52, %v515_v60 }
  0xa3   : > { %v541_v61 = vrot.slane %v539_v58, 4  ;;  %548 = vst.msk [vmem:[#allocation3 + $0x5c] sm:$0xf] %vm352_vm2, %v539_v58  ;;  %v540_v62 = vrot.slane %v537_v59, 4  ;;  %1468 = vmatprep.subr.bf16.mxu1 %v1532_v0  ;;  %v1241_v58 = vld [vmem:[%s1792_s6] sm:$0xff] }
  0xa5   : > { %v542_v63 = vsel %vm344_vm4, %v540_v62, %v541_v61 }
  0xa6   : > { %v544_v3 = vsel %vm543_vm11, %v537_v59, %v542_v63  ;;  %v566_v4 = vpop.permute.xlu1 %565  ;;  %v564_v5 = vpop.permute.xlu0 %563  ;;  %1469 = vmatpush3.bf16.msra.mxu1 %v1516_v1  ;;  %v1250_v59 = vld [vmem:[%s1793_s7] sm:$0xff] }
  0xa7   : > { %v568_v6 = vrot.slane %v566_v4, 4  ;;  %575 = vst.msk [vmem:[#allocation3 + $0x68] sm:$0xf] %vm352_vm2, %v566_v4  ;;  %v567_v7 = vrot.slane %v564_v5, 4  ;;  %v1370_v8 = vcombine.high %v517_v2, %v544_v3  ;;  %v1369_v10 = vcombine.low %v517_v2, %v544_v3  ;;  %1470 = vmatprep.subr.bf16.mxu1 %v1532_v0 }
  0xa9   : > { %v569_v11 = vsel %vm344_vm4, %v567_v7, %v568_v6  ;;  %687 = vmatprep.subr.bf16.mxu0 %v1370_v8 }
  0xaa   : > { %v571_v12 = vsel %vm570_vm12, %v564_v5, %v569_v11  ;;  %v1517_v13 = vld [vmem:[#allocation3 + $0x50] ss:$12 sps:$4 sm:$0xff]   ;;  %688 = vmatpush1.bf16.msra.mxu0 %v1369_v10 }
  0xab   : > { %v1373_v14 = vcombine.high %v571_v12, %v571_v12  ;;  %v1372_v15 = vcombine.low %v571_v12, %v571_v12  ;;  %1471 = vmatpush3.bf16.msra.mxu1 %v1517_v13 }
  0xac   : > { %1472 = vmatprep.subr.bf16.mxu1 %v1532_v0 }
  0xad   : > { %1375 = vmatprep.subr.msk.bf16.mxu0 %vm344_vm4, %v1373_v14  ;;  %v673_v17 = vsel %vm344_vm4, %v1372_v15, 0 }
  0xae   : > { %v1518_v18 = vld [vmem:[#allocation3 + $0x68] ss:$0 sps:$4 sm:$0xff]   ;;  %690 = vmatpush1.bf16.msra.mxu0 %v673_v17 }
  0xaf   : > { %v679_v19 = vsel %vm344_vm4, %v1518_v18, 0 }
  0xb0   : > { %1473 = vmatpush3.bf16.msra.mxu1 %v679_v19 }
  0xb1   : > { %1376 = vmatmul.mubr.msk.bf16.vlgmr.msra.gmra.mrb[0].mxu0 %vm667_vm13, %v576_v16  ;;  %1478 = vmatprep.subr.bf16.mxu1 %v1532_v0 }
  0xb2   : > { %1192 = vmatprep.mubr.bf16.mxu0 %v1540_v9 }
  0xb3   : > { %1475 = vmatmul.mubr.msk.bf16.vlgmr.msra.gmra.mrb[0].mxu1 %vm667_vm13, %v576_v16 }
  0xb4   : > { %1488 = vmatprep.mubr.msk.bf16.mxu1 %vm1541_vm3, %v1532_v0 }
  0xb7   : > { %v766_v22 = vpop.permute.xlu0 %765  ;;  %v775_v23 = vpop.permute.xlu1 %774 }
 0x184   : > { %v715_v24 = vpop.f32.mrb[0].mxu0 }
 0x185   : > { %v768_v27 = vmul.f32 %v766_v22, %v715_v24  ;;  %v717_v28 = vpop.f32.mrb[1].mxu0 }
 0x186   : > { %v769_v30 = vmul.f32 %v766_v22, %v717_v28  ;;  %v719_v9 = vpop.f32.mrb[2].mxu0  ;;  %v756_v31 = vpop.f32.mrb[0].mxu1 }
 0x187   : > { %v777_v33 = vadd.f32 %v775_v23, %v768_v27  ;;  %v720_v34 = vpop.f32.mrb[3].mxu0  ;;  %v770_v35 = vmul.f32 %v766_v22, %v756_v31  ;;  %v1476_v36 = vpop.f32.mrb[1].mxu1 }
 0x188   : > { %v778_v38 = vadd.f32 %v775_v23, %v769_v30  ;;  %v759_v39 = vpop.f32.mrb[2].mxu1 }
 0x189   : > { %vm780_vm14 = vcmp.ge.f32.partialorder %v777_v33, 0.0  ;;  %v783_v40 = vmul.f32 0.2, %v777_v33  ;;  %v779_v42 = vadd.f32 %v775_v23, %v770_v35  ;;  %v1477_v43 = vpop.f32.mrb[3].mxu1 }
 0x18a   : > { %vm781_vm15 = vcmp.ge.f32.partialorder %v778_v38, 0.0  ;;  %v784_v44 = vmul.f32 0.2, %v778_v38 }
 0x18b   : > { %v786_v46 = vsel %vm780_vm14, %v777_v33, %v783_v40  ;;  %vm782_vm0 = vcmp.ge.f32.partialorder %v779_v42, 0.0  ;;  %v785_v47 = vmul.f32 0.2, %v779_v42 }
 0x18c   : > { %v805_v48 = vmul.f32 %v1691_v37, %v786_v46  ;;  %v787_v49 = vsel %vm781_vm15, %v778_v38, %v784_v44 }
 0x18d   : > { %v806_v50 = vmul.f32 %v1693_v41, %v787_v49  ;;  %v788_v51 = vsel %vm782_vm0, %v779_v42, %v785_v47 }
 0x18e   : > { %v1434_v52 = vpack.c.bf16 %v805_v48, %v1532_v0  ;;  %v807_v53 = vmul.f32 %v1695_v45, %v788_v51 }
 0x18f   : > { %v1701_v54 = vpack.c.bf16 %v806_v50, %v805_v48 }
 0x190   : > { %829 = vrot.lane.b32.xlu1 %v1434_v52, %s1534_s12  ;;  %810 = vst.msk [vmem:[#allocation2 + $0x18] sm:$0xff] %vm317_vm1, %v807_v53 }
 0x194   : > { %860 = vrot.lane.b32.xlu1 %v1434_v52, %s1533_s11 }
 0x197   : > { %v955_v55 = vld [vmem:[#allocation2 + $0x18] sm:$0xff] }
 0x198   : > { %891 = vrot.lane.b32.xlu1 %v1434_v52, %s1535_s13  ;;  %v1445_v56 = vpack.c.bf16 %v955_v55, %v955_v55  ;;  %v1435_v57 = vpack.c.bf16 %v955_v55, %v806_v50 }
 0x19a   : > { %969 = vrot.lane.b32.xlu0 %v1445_v56, %s1537_s15  ;;  %952 = vst.msk [vmem:[#allocation3 + $0x38] sm:$0xf] %vm352_vm2, %v1445_v56 }
 0x19c   : > { %922 = vrot.lane.b32.xlu1 %v1434_v52, %s1536_s14 }
 0x19e   : > { %831 = vrot.lane.b32.xlu0 %v1435_v57, %s1534_s12 }
 0x1a0   : > { %967 = vrot.lane.b32.xlu1 %v1701_v54, %s1537_s15 }
 0x1a2   : > { %862 = vrot.lane.b32.xlu0 %v1435_v57, %s1533_s11 }
 0x1a4   : > { %993 = vrot.lane.b32.xlu1 %v1701_v54, %s1538_s16 }
 0x1a6   : > { %893 = vrot.lane.b32.xlu0 %v1435_v57, %s1535_s13 }
 0x1a8   : > { %1019 = vrot.lane.b32.xlu1 %v1701_v54, %s1539_s17 }
 0x1aa   : > { %924 = vrot.lane.b32.xlu0 %v1435_v57, %s1536_s14 }
 0x1ac   : > { %1045 = vrot.lane.b32.xlu1 %v1701_v54, %s1542_s18 }
 0x1ae   : > { %995 = vrot.lane.b32.xlu0 %v1445_v56, %s1538_s16  ;;  %s305_s16 = scalar_lea.vmem %s1794_s8, %s1492_s29 }
 0x1b0   : > { %1244 = vperm.xlu1 %1513, %v1241_v58  }
 0x1b2   : > { %1021 = vrot.lane.b32.xlu0 %v1445_v56, %s1539_s17 }
 0x1b6   : > { %1047 = vrot.lane.b32.xlu0 %v1445_v56, %s1542_s18 }
 0x1ba   : > { %1253 = vperm.xlu0 %1512, %v1250_v59  }
 0x202   : > { %v830_v60 = vpop.permute.xlu1 %829 }
 0x203   : > { %v833_v3 = vrot.slane %v830_v60, 4 }
 0x206   : > { %v861_v61 = vpop.permute.xlu1 %860 }
 0x207   : > { %v864_v14 = vrot.slane %v861_v61, 4 }
 0x20a   : > { %v892_v62 = vpop.permute.xlu1 %891 }
 0x20b   : > { %v895_v21 = vrot.slane %v892_v62, 4 }
 0x20c   : > { %v970_v63 = vpop.permute.xlu0 %969 }
 0x20d   : > { %978 = vst.msk [vmem:[#allocation3 + $0x44] sm:$0xf] %vm352_vm2, %v970_v63  ;;  %v972_v6 = vrot.slane %v970_v63, 4 }
 0x20e   : > { %v923_v1 = vpop.permute.xlu1 %922 }
 0x20f   : > { %v926_v30 = vrot.slane %v923_v1, 4 }
 0x210   : > { %v832_v2 = vpop.permute.xlu0 %831 }
 0x211   : > { %v834_v4 = vrot.slane %v832_v2, 4 }
 0x212   : > { %v968_v5 = vpop.permute.xlu1 %967 }
 0x213   : > { %v971_v7 = vrot.slane %v968_v5, 4  ;;  %v835_v8 = vsel %vm344_vm4, %v833_v3, %v834_v4  ;;  %v837_v10 = vsel %vm346_vm6, %v832_v2, %v834_v4 }
 0x214   : > { %v836_v11 = vsel %vm346_vm6, %v830_v60, %v835_v8  ;;  %841 = vst.msk [vmem:[#allocation3 + $0x8] sm:$0xf] %vm352_vm2, %v837_v10  ;;  %v863_v12 = vpop.permute.xlu0 %862 }
 0x215   : > { %v973_v13 = vsel %vm344_vm4, %v971_v7, %v972_v6  ;;  %v865_v15 = vrot.slane %v863_v12, 4 }
 0x216   : > { %v974_v16 = vsel %vm489_vm9, %v968_v5, %v973_v13  ;;  %v994_v25 = vpop.permute.xlu1 %993  ;;  %v1057_v5 = vld [vmem:[%s1791_s5] sm:$0xf] }
 0x217   : > { %v866_v17 = vsel %vm344_vm4, %v864_v14, %v865_v15  ;;  %v868_v18 = vsel %vm379_vm5, %v863_v12, %v865_v15  ;;  %v997_v39 = vrot.slane %v994_v25, 4  ;;  %v1403_v44 = vcombine.high %v1701_v54, %v974_v16 }
 0x218   : > { %v867_v19 = vsel %vm379_vm5, %v861_v61, %v866_v17  ;;  %872 = vst.msk [vmem:[#allocation3 + $0x14] sm:$0xf] %vm352_vm2, %v868_v18  ;;  %v894_v20 = vpop.permute.xlu0 %893  ;;  %v1402_v51 = vcombine.low %v1701_v54, %v974_v16 }
 0x219   : > { %v896_v22 = vrot.slane %v894_v20, 4  ;;  %v1396_v23 = vcombine.low %v836_v11, %v867_v19  ;;  %v1397_v24 = vcombine.high %v836_v11, %v867_v19 }
 0x21a   : > { %v1020_v36 = vpop.permute.xlu1 %1019 }
 0x21b   : > { %v897_v26 = vsel %vm344_vm4, %v895_v21, %v896_v22  ;;  %v899_v27 = vsel %vm411_vm7, %v894_v20, %v896_v22  ;;  %1160 = vmatprep.subr.bf16.mxu0 %v1397_v24  ;;  %v1023_v49 = vrot.slane %v1020_v36, 4 }
 0x21c   : > { %v898_v28 = vsel %vm411_vm7, %v892_v62, %v897_v26  ;;  %903 = vst.msk [vmem:[#allocation3 + $0x20] sm:$0xf] %vm352_vm2, %v899_v27  ;;  %v925_v29 = vpop.permute.xlu0 %924  ;;  %1161 = vmatpush1.bf16.msra.mxu0 %v1396_v23  ;;  %v1521_v62 = vld [vmem:[#allocation3 + $0x38] ss:$12 sps:$4 sm:$0xff]  }
 0x21d   : > { %v927_v9 = vrot.slane %v925_v29, 4 }
 0x21e   : > { %v1046_v50 = vpop.permute.xlu1 %1045 }
 0x21f   : > { %v928_v31 = vsel %vm344_vm4, %v926_v30, %v927_v9  ;;  %v930_v32 = vsel %vm443_vm8, %v925_v29, %v927_v9  ;;  %v1519_v33 = vld [vmem:[#allocation3 + $0x8] ss:$12 sps:$4 sm:$0xff]   ;;  %v1049_v58 = vrot.slane %v1046_v50, 4 }
 0x220   : > { %v929_v34 = vsel %vm443_vm8, %v923_v1, %v928_v31  ;;  %934 = vst.msk [vmem:[#allocation3 + $0x2c] sm:$0xf] %vm352_vm2, %v930_v32  ;;  %v996_v35 = vpop.permute.xlu0 %995  ;;  %1479 = vmatpush3.bf16.msra.mxu1 %v1519_v33 }
 0x221   : > { %v998_v38 = vrot.slane %v996_v35, 4  ;;  %1004 = vst.msk [vmem:[#allocation3 + $0x50] sm:$0xf] %vm352_vm2, %v996_v35  ;;  %v1399_v40 = vcombine.low %v898_v28, %v929_v34  ;;  %v1400_v42 = vcombine.high %v898_v28, %v929_v34  ;;  %1480 = vmatprep.subr.bf16.mxu1 %v1532_v0 }
 0x223   : > { %v999_v43 = vsel %vm344_vm4, %v997_v39, %v998_v38  ;;  %1162 = vmatprep.subr.bf16.mxu0 %v1400_v42 }
 0x224   : > { %v1000_v46 = vsel %vm516_vm10, %v994_v25, %v999_v43  ;;  %v1022_v47 = vpop.permute.xlu0 %1021  ;;  %1163 = vmatpush1.bf16.msra.mxu0 %v1399_v40 }
 0x225   : > { %v1024_v48 = vrot.slane %v1022_v47, 4  ;;  %1030 = vst.msk [vmem:[#allocation3 + $0x5c] sm:$0xf] %vm352_vm2, %v1022_v47  ;;  %1164 = vmatprep.subr.bf16.mxu0 %v1403_v44 }
 0x227   : > { %v1025_v52 = vsel %vm344_vm4, %v1023_v49, %v1024_v48  ;;  %v1520_v53 = vld [vmem:[#allocation3 + $0x20] ss:$12 sps:$4 sm:$0xff]  }
 0x228   : > { %v1026_v55 = vsel %vm543_vm11, %v1020_v36, %v1025_v52  ;;  %v1048_v56 = vpop.permute.xlu0 %1047  ;;  %1165 = vmatpush1.bf16.msra.mxu0 %v1402_v51  ;;  %1481 = vmatpush3.bf16.msra.mxu1 %v1520_v53 }
 0x229   : > { %v1050_v57 = vrot.slane %v1048_v56, 4  ;;  %1056 = vst.msk [vmem:[#allocation3 + $0x68] sm:$0xf] %vm352_vm2, %v1048_v56  ;;  %v1405_v59 = vcombine.low %v1000_v46, %v1026_v55  ;;  %v1406_v60 = vcombine.high %v1000_v46, %v1026_v55  ;;  %1482 = vmatprep.subr.bf16.mxu1 %v1532_v0 }
 0x22b   : > { %v1051_v61 = vsel %vm344_vm4, %v1049_v58, %v1050_v57  ;;  %1166 = vmatprep.subr.bf16.mxu0 %v1406_v60 }
 0x22c   : > { %v1052_v54 = vsel %vm570_vm12, %v1046_v50, %v1051_v61  ;;  %1167 = vmatpush1.bf16.msra.mxu0 %v1405_v59  ;;  %1483 = vmatpush3.bf16.msra.mxu1 %v1521_v62  ;;  %v1522_v2 = vld [vmem:[#allocation3 + $0x50] ss:$12 sps:$4 sm:$0xff]  }
 0x22d   : > { %v1409_v63 = vcombine.high %v1052_v54, %v1052_v54  ;;  %v1408_v1 = vcombine.low %v1052_v54, %v1052_v54  ;;  %1484 = vmatprep.subr.bf16.mxu1 %v1532_v0 }
 0x22f   : > { %1411 = vmatprep.subr.msk.bf16.mxu0 %vm344_vm4, %v1409_v63  ;;  %v1152_v3 = vsel %vm344_vm4, %v1408_v1, 0  ;;  %v1245_v7 = vpop.permute.xlu1 %1244 }
 0x230   : > { %v1523_v4 = vld [vmem:[#allocation3 + $0x68] ss:$0 sps:$4 sm:$0xff]   ;;  %1169 = vmatpush1.bf16.msra.mxu0 %v1152_v3  ;;  %1485 = vmatpush3.bf16.msra.mxu1 %v1522_v2 }
 0x231   : > { %1486 = vmatprep.subr.bf16.mxu1 %v1532_v0  ;;  %v1158_v6 = vsel %vm344_vm4, %v1523_v4, 0 }
 0x233   : > { %1412 = vmatmul.mubr.msk.bf16.vlgmr.msra.gmra.mrb[4].mxu0 %vm667_vm13, %v1057_v5 }
 0x234   : > { %1487 = vmatpush3.bf16.msra.mxu1 %v1158_v6 }
 0x237   : > { %1489 = vmatmul.mubr.msk.bf16.vlgmr.msra.gmra.mrb[4].mxu1 %vm667_vm13, %v1057_v5 }
 0x239   : > { %v1254_v12 = vpop.permute.xlu0 %1253 }
 0x306   : > { %v1194_v8 = vpop.f32.mrb[4].mxu0 }
 0x307   : > { %v1247_v10 = vmul.f32 %v1245_v7, %v1194_v8  ;;  %v1196_v11 = vpop.f32.mrb[5].mxu0 }
 0x308   : > { %v1248_v13 = vmul.f32 %v1245_v7, %v1196_v11  ;;  %v1198_v14 = vpop.f32.mrb[6].mxu0 }
 0x309   : > { %v1256_v15 = vadd.f32 %v1254_v12, %v1247_v10  ;;  %v1199_v16 = vpop.f32.mrb[7].mxu0 }
 0x30a   : > { %v1257_v17 = vadd.f32 %v1254_v12, %v1248_v13  ;;  %v1235_v18 = vpop.f32.mrb[4].mxu1 }
 0x30b   : > { %vm1259_vm2 = vcmp.ge.f32.partialorder %v1256_v15, 0.0  ;;  %v1262_v0 = vmul.f32 0.2, %v1256_v15  ;;  %v1249_v19 = vmul.f32 %v1245_v7, %v1235_v18  ;;  %v1490_v20 = vpop.f32.mrb[5].mxu1 }
 0x30c   : > { %vm1260_vm3 = vcmp.ge.f32.partialorder %v1257_v17, 0.0  ;;  %v1263_v21 = vmul.f32 0.2, %v1257_v17  ;;  %v1238_v23 = vpop.f32.mrb[6].mxu1 }
 0x30d   : > { %v1265_v22 = vsel %vm1259_vm2, %v1256_v15, %v1262_v0  ;;  %v1258_v24 = vadd.f32 %v1254_v12, %v1249_v19  ;;  %v1491_v27 = vpop.f32.mrb[7].mxu1 }
 0x30e   : > { %v1268_v25 = vmul.f32 %v1265_v22, %v1691_v37  ;;  %v1266_v26 = vsel %vm1260_vm3, %v1257_v17, %v1263_v21 }
 0x30f   : > { %v1269_v28 = vmul.f32 %v1266_v26, %v1693_v41  ;;  %vm1261_vm4 = vcmp.ge.f32.partialorder %v1258_v24, 0.0  ;;  %v1264_v29 = vmul.f32 0.2, %v1258_v24 }
 0x310   : > { %1277 = vst [vmem:[%s305_s16] sm:$0xff] %v1268_v25 }
 0x311   : > { %1278 = vst [vmem:[%s305_s16 + $0x8] sm:$0xff] %v1269_v28  ;;  %v1267_v30 = vsel %vm1261_vm4, %v1258_v24, %v1264_v29 }
 0x312   : > { %v1270_v9 = vmul.f32 %v1267_v30, %v1695_v45 }
 0x314   : > { %1273 = vst.msk [vmem:[#allocation2 + $0x18] sm:$0xff] %vm317_vm1, %v1270_v9 }
 0x31b   : > { %v1276_v31 = vld [vmem:[#allocation2 + $0x18] sm:$0xff] }
 0x31c   : > { %1279 = vst.msk [vmem:[%s305_s16 + $0x10] sm:$0xff] %vm317_vm1, %v1276_v31 }
 0x31d PF: > { %s18_s27 = sadd.s32 1, %s1530_s27  }
 0x31e   : > { %p15_p4 = scmp.ge.s32.totalorder %s18_s27, 4  }
 0x320   :  { %17 = sbr.rel (!%p15_p4) target bundleno = 1 (0x1), region = 82 }

// kernel: image_encoder_forward.4
= control target key start
LH: loop header
LB: loop body
LE: loop exit
PB: predicated region body
PF: predicated region fallthrough
CT: control target
= control target key end

     0   :  { %s898_s27 = smov 0   ;;  %s1033_s0 = inlined_call_operand.vmem [shape: f32[2,8,100], index: 0, kind: input, shape index: {}]   ;;  %s1034_s1 = inlined_call_operand.vmem [shape: f32[1,100], index: 1, kind: input, shape index: {}]   ;;  %s1035_s2 = inlined_call_operand.vmem [shape: bf16[16,72], index: 2, kind: input, shape index: {}]   ;;  %s1036_s3 = inlined_call_operand.vmem [shape: f32[16,1], index: 3, kind: input, shape index: {}]   ;;  %s1037_s4 = inlined_call_operand.vmem [shape: f32[16,1], index: 4, kind: input, shape index: {}]   ;;  %s1038_s5 = inlined_call_operand.vmem [shape: bf16[16,144], index: 5, kind: input, shape index: {}]   ;;  %s1039_s6 = inlined_call_operand.vmem [shape: f32[16,1], index: 6, kind: input, shape index: {}]   ;;  %s1040_s7 = inlined_call_operand.vmem [shape: f32[16,1], index: 7, kind: input, shape index: {}]   ;;  %s1041_s8 = inlined_call_operand.vmem [shape: f32[2,16,100], index: 8, kind: output, shape index: {}]  }
   0x1 LB: > { %s771_s28 = sadd.s32 4294967295, %s839_s27   ;;  %p775_p0 = scmp.ge.s32.totalorder %s839_s27, 1  ;;  %s839_s27 = sphi %s898_s27, %s18_s27  }
   0x2   : > { %p261_p1 = scmp.lt.s32.totalorder %s839_s27, 3 }
   0x4   : > { %p262_p2 = pnand %p775_p0, %p261_p1 }
   0x5   : > { %vm305_vm0 = vcmask (!%p262_p2), 908288   ;;  %p294_p3 = scmp.lt.s32.totalorder (!%p262_p2), %s771_s28, 1  ;;  %v841_v0 = vmov (!%p262_p2), 0.0   ;;  %v842_v1 = vmov (!%p262_p2), 0.0|0.0   ;;  %s843_s29 = smov (!%p262_p2), 11   ;;  %vm310_vm1 = vcmask (!%p262_p2), 818176  }
   0x6   : > { %265 = sbr.rel (%p262_p2) target bundleno = 798 (0x31e), region = 52  ;;  %306 = vst.msk [vmem:[#allocation2 + $0x8] sm:$0xff] (!%p262_p2), %vm305_vm0, %v841_v0  ;;  %308 = vst.msk [vmem:[#allocation2 + $0x18] sm:$0xff] (!%p262_p2), %vm305_vm0, %v841_v0  ;;  %794 = vmatprep.subr.bf16.mxu0 (!%p262_p2), %v841_v0  ;;  %319 = vrot.lane.b32.xlu0 (!%p262_p2), %v842_v1, %s843_s29  ;;  %v334_v2 = vrot.slane (!%p262_p2), %v842_v1, 4  ;;  %s844_s30 = smov (!%p262_p2), 10   ;;  %vm326_vm2 = vcmask (!%p262_p2), 814080  }
   0x7   : > { %s845_s13 = smov (!%p262_p2), 9   ;;  %s846_s14 = smov (!%p262_p2), 1   ;;  %vm851_vm3 = vmmov (!%p262_p2), 0   ;;  %v470_v7 = vld [vmem:[%s1036_s3 + $0x8] sm:$0xff] (!%p262_p2)  ;;  %v469_v8 = vld [vmem:[%s1036_s3] sm:$0xff] (!%p262_p2)  ;;  %v852_v9 = vmov (!%p262_p2), 0  }
   0x8   : > { %336 = vrot.lane.b32.xlu1 (!%p262_p2), %v334_v2, %s844_s30  ;;  %s847_s15 = smov (!%p262_p2), 127   ;;  %s848_s16 = smov (!%p262_p2), 119   ;;  %804 = vmatprep.mubr.msk.bf16.mxu0 (!%p262_p2), %vm851_vm3, %v841_v0  ;;  %v483_v10 = vld [vmem:[%s1037_s4] sm:$0xff] (!%p262_p2)  ;;  %v484_v11 = vld [vmem:[%s1037_s4 + $0x8] sm:$0xff] (!%p262_p2)  ;;  %vm355_vm4 = vcmask (!%p262_p2), 72704   ;;  %vm323_vm5 = vcmask (!%p262_p2), 89088  }
   0x9   : > { %s849_s17 = smov (!%p262_p2), 118   ;;  %s850_s18 = smov (!%p262_p2), 117   ;;  %828 = vset.pattern.permute.xlu1 (!%p262_p2), %v852_v9  ;;  %827 = vset.pattern.permute.xlu0 (!%p262_p2), %v852_v9  ;;  %vm340_vm6 = vcmask (!%p262_p2), 80896   ;;  %vm343_vm7 = vcmask (!%p262_p2), 818180   ;;  %vm371_vm8 = vcmask (!%p262_p2), 7168   ;;  %vm424_vm9 = vcmask (!%p262_p2), 1043456  }
   0xa   : > { %351 = vrot.lane.b32.xlu0 (!%p262_p2), %v842_v1, %s845_s13  ;;  %633 = vmatprep.subr.bf16.mxu1 (!%p262_p2), %v852_v9  ;;  %v829_v34 = vld [vmem:[%s1035_s2] sm:$0xff] (!%p262_p2)   ;;  %vm420_vm10 = vcmask (!%p262_p2), 588800   ;;  %v675_v59 = vld [vmem:[%s1039_s6 + $0x8] sm:$0xff] (!%p262_p2)  ;;  %vm629_vm13 = vcmask (!%p262_p2), 130048  }
   0xb   : > { %v967_v46 = vld [vmem:[%s1034_s1] ss:$0 sm:$0xff] (!%p262_p2)  ;;  %v689_v60 = vld [vmem:[%s1040_s7 + $0x8] sm:$0xff] (!%p262_p2) }
   0xc   : > { %v674_v57 = vld [vmem:[%s1039_s6] sm:$0xff] (!%p262_p2) }
   0xd   : > { %s1043_s28 = smov (!%p294_p3, %s771_s28), 1  ;;  %v688_v58 = vld [vmem:[%s1040_s7] sm:$0xff] }
   0xe   : > { %s776_s9 = sshll.u32 %s1043_s28, 3  ;;  %v832_v61 = vld [vmem:[%s1038_s5 + $0x4] ss:$8 sps:$4 sm:$0xff]  }
   0xf   : > { %s297_s12 = scalar_lea.vmem %s1033_s0, %s776_s9  ;;  %784 = vmatprep.mubr.msk.bf16.mxu1 %vm629_vm13, %v832_v61 }
  0x10   : > { %v309_v3 = vld [vmem:[%s297_s12] sm:$0xff] }
  0x11   : > { %311 = vst.msk [vmem:[#allocation2 + $0x8] sm:$0xff] %vm310_vm1, %v309_v3 }
  0x18   : > { %v346_v4 = vld [vmem:[#allocation2 + $0x8] sm:$0xff] }
  0x19   : > { %v348_v5 = vpack.c.bf16 %v346_v4, %v346_v4 }
  0x1b   : > { %353 = vrot.lane.b32.xlu1 %v348_v5, %s845_s13  ;;  %321 = vrot.lane.b32.xlu0 %v348_v5, %s843_s29  ;;  %v335_v6 = vrot.slane %v348_v5, 4  ;;  %377 = vst.msk [vmem:[#allocation3 + $0x10] sm:$0xf] %vm326_vm2, %v348_v5 }
  0x1f   : > { %338 = vrot.lane.b32.xlu1 %v335_v6, %s844_s30  ;;  %367 = vrot.lane.b32.xlu0 %v334_v2, %s846_s14 }
  0x23   : > { %369 = vrot.lane.b32.xlu1 %v335_v6, %s846_s14  ;;  %382 = vrot.lane.b32.xlu0 %v335_v6, %s847_s15 }
  0x27   : > { %389 = vrot.lane.b32.xlu1 %v348_v5, %s848_s16  ;;  %397 = vrot.lane.b32.xlu0 %v335_v6, %s849_s17 }
  0x2b   : > { %404 = vrot.lane.b32.xlu1 %v348_v5, %s850_s18  ;;  %473 = vperm.xlu0 %827, %v469_v8  }
  0x2f   : > { %478 = vperm.xlu1 %828, %v470_v7   ;;  %492 = vperm.xlu0 %827, %v484_v11  }
  0x33   : > { %487 = vperm.xlu1 %828, %v483_v10  }
  0x37   : > { %521 = vrot.lane.b32.xlu1 %v842_v1, %s843_s29 }
  0x3b   : > { %536 = vrot.lane.b32.xlu1 %v842_v1, %s844_s30 }
  0x3f   : > { %551 = vrot.lane.b32.xlu1 %v842_v1, %s845_s13 }
  0x43   : > { %566 = vrot.lane.b32.xlu1 %v842_v1, %s846_s14 }
  0x78   : > { %v320_v12 = vpop.permute.xlu0 %319 }
  0x7a   : > { %v337_v13 = vpop.permute.xlu1 %336 }
  0x7c   : > { %v352_v14 = vpop.permute.xlu0 %351 }
  0x8d   : > { %v354_v15 = vpop.permute.xlu1 %353  ;;  %v322_v16 = vpop.permute.xlu0 %321 }
  0x8e   : > { %v356_v17 = vsel %vm355_vm4, %v352_v14, %v354_v15  ;;  %v324_v18 = vsel %vm323_vm5, %v320_v12, %v322_v16 }
  0x8f   : > { %358 = vst.msk [vmem:[#allocation3 + $0x8] sm:$0xf] %vm326_vm2, %v356_v17  ;;  %327 = vst.msk [vmem:[#allocation3] sm:$0xf] %vm326_vm2, %v324_v18 }
  0x91   : > { %v339_v19 = vpop.permute.xlu1 %338  ;;  %v368_v20 = vpop.permute.xlu0 %367 }
  0x92   : > { %v341_v21 = vsel %vm340_vm6, %v337_v13, %v339_v19 }
  0x93   : > { %344 = vst.msk [vmem:[#allocation3] sm:$0xf0] %vm343_vm7, %v341_v21 }
  0x95   : > { %v370_v22 = vpop.permute.xlu1 %369  ;;  %v383_v23 = vpop.permute.xlu0 %382 }
  0x96   : > { %v372_v24 = vsel %vm371_vm8, %v368_v20, %v370_v22  ;;  %385 = vst.msk [vmem:[#allocation3 + $0x10] sm:$0xf0] %vm343_vm7, %v383_v23 }
  0x97   : > { %374 = vst.msk [vmem:[#allocation3 + $0x8] sm:$0xf0] %vm343_vm7, %v372_v24  ;;  %v830_v24 = vld [vmem:[%s1038_s5] ss:$8 sps:$4 sm:$0xff]  }
  0x99   : > { %v390_v25 = vpop.permute.xlu1 %389  ;;  %v398_v26 = vpop.permute.xlu0 %397 }
  0x9a   : > { %v410_v27 = vld [vmem:[#allocation3] sm:$0xff]  ;;  %392 = vst.msk [vmem:[#allocation3 + $0x18] sm:$0xf] %vm326_vm2, %v390_v25 }
  0x9b   : > { %400 = vst.msk [vmem:[#allocation3 + $0x18] sm:$0xf0] %vm343_vm7, %v398_v26  ;;  %795 = vmatpush3.bf16.msra.mxu0 %v410_v27 }
  0x9c   : > { %796 = vmatprep.subr.bf16.mxu0 %v841_v0 }
  0x9d   : > { %v405_v28 = vpop.permute.xlu1 %404  ;;  %v412_v30 = vld [vmem:[#allocation3 + $0x10] sm:$0xff] }
  0x9e   : > { %v411_v29 = vld [vmem:[#allocation3 + $0x8] sm:$0xff]  ;;  %407 = vst.msk [vmem:[#allocation3 + $0x20] sm:$0xf] %vm326_vm2, %v405_v28 }
  0x9f   : > { %797 = vmatpush3.bf16.msra.mxu0 %v411_v29 }
  0xa0   : > { %798 = vmatprep.subr.bf16.mxu0 %v841_v0 }
  0xa2   : > { %v413_v31 = vld [vmem:[#allocation3 + $0x18] sm:$0xff] }
  0xa3   : > { %799 = vmatpush3.bf16.msra.mxu0 %v412_v30 }
  0xa4   : > { %800 = vmatprep.subr.bf16.mxu0 %v841_v0 }
  0xa5   : > { %v414_v32 = vld [vmem:[#allocation3 + $0x20] sm:$0xf] }
  0xa6   : > { %v426_v33 = vsel %vm424_vm9, %v414_v32, 0 }
  0xa7   : > { %801 = vmatpush3.bf16.msra.mxu0 %v413_v31 }
  0xa8   : > { %802 = vmatprep.subr.bf16.mxu0 %v841_v0 }
  0xaa   : > { %v474_v36 = vpop.permute.xlu0 %473 }
  0xab   : > { %803 = vmatpush3.bf16.msra.mxu0 %v426_v33 }
  0xae   : > { %805 = vmatmul.mubr.msk.bf16.vlgmr.msra.gmra.mrb[0].mxu0 %vm420_vm10, %v829_v34  ;;  %v479_v35 = vpop.permute.xlu1 %478  ;;  %v493_v45 = vpop.permute.xlu0 %492 }
  0xb2   : > { %v488_v40 = vpop.permute.xlu1 %487 }
  0xb6   : > { %v522_v62 = vpop.permute.xlu1 %521 }
  0xba   : > { %v537_v63 = vpop.permute.xlu1 %536 }
  0xbe   : > { %v552_v0 = vpop.permute.xlu1 %551 }
  0xc2   : > { %v567_v1 = vpop.permute.xlu1 %566 }
 0x181   : > { %v462_v37 = vpop.f32.mrb[0].mxu0 }
 0x182   : > { %v481_v38 = vmul.f32 %v474_v36, %v462_v37  ;;  %v806_v39 = vpop.f32.mrb[1].mxu0 }
 0x183   : > { %v465_v41 = vpop.f32.mrb[2].mxu0 }
 0x184   : > { %v495_v42 = vadd.f32 %v488_v40, %v481_v38  ;;  %v482_v43 = vmul.f32 %v479_v35, %v465_v41  ;;  %v807_v44 = vpop.f32.mrb[3].mxu0 }
 0x186   : > { %vm497_vm11 = vcmp.ge.f32.partialorder %v495_v42, 0.0  ;;  %v499_v47 = vmul.f32 0.2, %v495_v42  ;;  %v496_v48 = vadd.f32 %v493_v45, %v482_v43 }
 0x188   : > { %v501_v49 = vsel %vm497_vm11, %v495_v42, %v499_v47  ;;  %vm498_vm12 = vcmp.ge.f32.partialorder %v496_v48, 0.0  ;;  %v500_v50 = vmul.f32 0.2, %v496_v48 }
 0x189   : > { %v509_v51 = vmul.f32 %v967_v46, %v501_v49 }
 0x18a   : > { %v502_v52 = vsel %vm498_vm12, %v496_v48, %v500_v50 }
 0x18b   : > { %511 = vst.msk [vmem:[#allocation2 + $0x8] sm:$0xff] %vm310_vm1, %v509_v51  ;;  %v510_v53 = vmul.f32 %v967_v46, %v502_v52 }
 0x18d   : > { %512 = vst.msk [vmem:[#allocation2 + $0x18] sm:$0xff] %vm310_vm1, %v510_v53 }
 0x192   : > { %v577_v54 = vld [vmem:[#allocation2 + $0x8] sm:$0xff] }
 0x194   : > { %v578_v55 = vld [vmem:[#allocation2 + $0x18] sm:$0xff] }
 0x195   : > { %v579_v56 = vpack.c.bf16 %v578_v55, %v577_v54 }
 0x197   : > { %581 = vrot.lane.b32.xlu1 %v579_v56, %s847_s15  ;;  %523 = vrot.lane.b32.xlu0 %v579_v56, %s843_s29  ;;  %576 = vst.msk [vmem:[#allocation3 + $0x20] sm:$0xff] %vm310_vm1, %v579_v56 }
 0x19b   : > { %597 = vrot.lane.b32.xlu1 %v579_v56, %s849_s17  ;;  %538 = vrot.lane.b32.xlu0 %v579_v56, %s844_s30 }
 0x19e   : > { %v615_v19 = vld [vmem:[#allocation3 + $0x20] sm:$0xff] }
 0x19f   : > { %678 = vperm.xlu1 %828, %v674_v57   ;;  %553 = vrot.lane.b32.xlu0 %v579_v56, %s845_s13 }
 0x1a3   : > { %692 = vperm.xlu1 %828, %v688_v58   ;;  %568 = vrot.lane.b32.xlu0 %v579_v56, %s846_s14 }
 0x1a7   : > { %589 = vrot.lane.b32.xlu0 %v579_v56, %s848_s16 }
 0x1ab   : > { %605 = vrot.lane.b32.xlu0 %v579_v56, %s850_s18  ;;  %s787_s18 = sshll.u32 %s1043_s28, 4 }
 0x1ac   : > { %s302_s26 = scalar_lea.vmem %s1041_s8, %s787_s18 }
 0x1af   : > { %683 = vperm.xlu0 %827, %v675_v59  }
 0x1b3   : > { %697 = vperm.xlu0 %827, %v689_v60  }
 0x209   : > { %v582_v2 = vpop.permute.xlu1 %581  ;;  %v524_v3 = vpop.permute.xlu0 %523 }
 0x20a   : > { %584 = vst.msk [vmem:[#allocation3 + $0x28] sm:$0xff] %vm310_vm1, %v582_v2  ;;  %v525_v4 = vsel %vm323_vm5, %v522_v62, %v524_v3 }
 0x20b   : > { %527 = vst.msk [vmem:[#allocation3] sm:$0xff] %vm310_vm1, %v525_v4 }
 0x20d   : > { %v598_v5 = vpop.permute.xlu1 %597  ;;  %v539_v6 = vpop.permute.xlu0 %538 }
 0x20e   : > { %600 = vst.msk [vmem:[#allocation3 + $0x38] sm:$0xff] %vm310_vm1, %v598_v5  ;;  %v540_v7 = vsel %vm340_vm6, %v537_v63, %v539_v6 }
 0x20f   : > { %542 = vst.msk [vmem:[#allocation3 + $0x8] sm:$0xff] %vm310_vm1, %v540_v7 }
 0x211   : > { %v554_v8 = vpop.permute.xlu0 %553  ;;  %v616_v20 = vld [vmem:[#allocation3 + $0x28] sm:$0xff] }
 0x212   : > { %v555_v10 = vsel %vm355_vm4, %v552_v0, %v554_v8  ;;  %v611_v11 = vld [vmem:[#allocation3] sm:$0xff] }
 0x213   : > { %557 = vst.msk [vmem:[#allocation3 + $0x10] sm:$0xff] %vm310_vm1, %v555_v10  ;;  %634 = vmatpush1.bf16.msra.mxu1 %v611_v11 }
 0x214   : > { %635 = vmatprep.subr.bf16.mxu1 %v852_v9 }
 0x215   : > { %v569_v12 = vpop.permute.xlu0 %568  ;;  %v618_v22 = vld [vmem:[#allocation3 + $0x38] sm:$0xff] }
 0x216   : > { %v570_v13 = vsel %vm371_vm8, %v567_v1, %v569_v12  ;;  %v612_v14 = vld [vmem:[#allocation3 + $0x8] sm:$0xff] }
 0x217   : > { %572 = vst.msk [vmem:[#allocation3 + $0x18] sm:$0xff] %vm310_vm1, %v570_v13  ;;  %636 = vmatpush1.bf16.msra.mxu1 %v612_v14 }
 0x218   : > { %637 = vmatprep.subr.bf16.mxu1 %v852_v9 }
 0x219   : > { %v590_v15 = vpop.permute.xlu0 %589 }
 0x21a   : > { %592 = vst.msk [vmem:[#allocation3 + $0x30] sm:$0xff] %vm310_vm1, %v590_v15  ;;  %v613_v16 = vld [vmem:[#allocation3 + $0x10] sm:$0xff] }
 0x21b   : > { %638 = vmatpush1.bf16.msra.mxu1 %v613_v16 }
 0x21c   : > { %639 = vmatprep.subr.bf16.mxu1 %v852_v9 }
 0x21d   : > { %v606_v17 = vpop.permute.xlu0 %605 }
 0x21e   : > { %608 = vst.msk [vmem:[#allocation3 + $0x40] sm:$0xff] %vm310_vm1, %v606_v17  ;;  %v614_v18 = vld [vmem:[#allocation3 + $0x18] sm:$0xff]  ;;  %v679_v25 = vpop.permute.xlu1 %678 }
 0x21f   : > { %640 = vmatpush1.bf16.msra.mxu1 %v614_v18 }
 0x220   : > { %641 = vmatprep.subr.bf16.mxu1 %v852_v9 }
 0x221   : > { %v617_v21 = vld [vmem:[#allocation3 + $0x30] sm:$0xff] }
 0x222   : > { %v693_v30 = vpop.permute.xlu1 %692 }
 0x223   : > { %642 = vmatpush1.bf16.msra.mxu1 %v615_v19 }
 0x224   : > { %643 = vmatprep.subr.bf16.mxu1 %v852_v9 }
 0x225   : > { %v619_v23 = vld [vmem:[#allocation3 + $0x40] sm:$0xff] }
 0x227   : > { %644 = vmatpush1.bf16.msra.mxu1 %v616_v20 }
 0x228   : > { %645 = vmatprep.subr.bf16.mxu1 %v852_v9 }
 0x22b   : > { %646 = vmatpush1.bf16.msra.mxu1 %v617_v21 }
 0x22c   : > { %647 = vmatprep.subr.bf16.mxu1 %v852_v9 }
 0x22e   : > { %v684_v26 = vpop.permute.xlu0 %683 }
 0x22f   : > { %648 = vmatpush1.bf16.msra.mxu1 %v618_v22 }
 0x230   : > { %649 = vmatprep.subr.bf16.mxu1 %v852_v9 }
 0x232   : > { %v698_v35 = vpop.permute.xlu0 %697 }
 0x233   : > { %650 = vmatpush1.bf16.msra.mxu1 %v619_v23 }
 0x236   : > { %666 = vmatmul.mubr.bf16.vlgmr.msra.gmra.mrb[0].mxu1 %v830_v24 }
 0x309   : > { %v667_v27 = vpop.f32.mrb[0].mxu1 }
 0x30a   : > { %v686_v28 = vmul.f32 %v679_v25, %v667_v27  ;;  %v669_v29 = vpop.f32.mrb[1].mxu1 }
 0x30b   : > { %v670_v31 = vpop.f32.mrb[2].mxu1 }
 0x30c   : > { %v700_v32 = vadd.f32 %v693_v30, %v686_v28  ;;  %v687_v33 = vmul.f32 %v684_v26, %v670_v31  ;;  %v672_v34 = vpop.f32.mrb[3].mxu1 }
 0x30e   : > { %vm702_vm14 = vcmp.ge.f32.partialorder %v700_v32, 0.0  ;;  %v704_v9 = vmul.f32 0.2, %v700_v32  ;;  %v701_v36 = vadd.f32 %v698_v35, %v687_v33 }
 0x310   : > { %v706_v37 = vsel %vm702_vm14, %v700_v32, %v704_v9  ;;  %vm703_vm15 = vcmp.ge.f32.partialorder %v701_v36, 0.0  ;;  %v705_v38 = vmul.f32 0.2, %v701_v36 }
 0x311   : > { %v708_v39 = vmul.f32 %v967_v46, %v706_v37 }
 0x312   : > { %v707_v40 = vsel %vm703_vm15, %v701_v36, %v705_v38 }
 0x313   : > { %710 = vst.msk [vmem:[#allocation2 + $0x8] sm:$0xff] %vm310_vm1, %v708_v39  ;;  %v709_v41 = vmul.f32 %v967_v46, %v707_v40 }
 0x315   : > { %711 = vst.msk [vmem:[#allocation2 + $0x18] sm:$0xff] %vm310_vm1, %v709_v41 }
 0x31a   : > { %v712_v42 = vld [vmem:[#allocation2 + $0x8] sm:$0xff] }
 0x31b   : > { %714 = vst.msk [vmem:[%s302_s26] sm:$0xff] %vm310_vm1, %v712_v42 }
 0x31c   : > { %v713_v43 = vld [vmem:[#allocation2 + $0x18] sm:$0xff] }
 0x31d   : > { %715 = vst.msk [vmem:[%s302_s26 + $0x8] sm:$0xff] %vm310_vm1, %v713_v43 }
 0x31e PF: > { %s18_s27 = sadd.s32 1, %s839_s27  }
 0x31f   : > { %p15_p4 = scmp.ge.s32.totalorder %s18_s27, 4  }
 0x321   :  { %17 = sbr.rel (!%p15_p4) target bundleno = 1 (0x1), region = 82 }

// kernel: image_encoder_forward.5
= control target key start
LH: loop header
LB: loop body
LE: loop exit
PB: predicated region body
PF: predicated region fallthrough
CT: control target
= control target key end

     0   :  { %s1249_s27 = smov 0   ;;  %s1475_s0 = inlined_call_operand.vmem [shape: f32[2,16,36], index: 0, kind: input, shape index: {}]   ;;  %s1476_s1 = inlined_call_operand.vmem [shape: f32[1,36], index: 1, kind: input, shape index: {}]   ;;  %s1477_s2 = inlined_call_operand.vmem [shape: bf16[32,144], index: 2, kind: input, shape index: {}]   ;;  %s1478_s3 = inlined_call_operand.vmem [shape: f32[32,1], index: 3, kind: input, shape index: {}]   ;;  %s1479_s4 = inlined_call_operand.vmem [shape: f32[32,1], index: 4, kind: input, shape index: {}]   ;;  %s1480_s5 = inlined_call_operand.vmem [shape: bf16[32,288], index: 5, kind: input, shape index: {}]   ;;  %s1481_s6 = inlined_call_operand.vmem [shape: f32[32,1], index: 6, kind: input, shape index: {}]   ;;  %s1482_s7 = inlined_call_operand.vmem [shape: f32[32,1], index: 7, kind: input, shape index: {}]   ;;  %s1483_s8 = inlined_call_operand.vmem [shape: f32[2,32,36], index: 8, kind: output, shape index: {}]  }
   0x1 LB: > { %s1083_s28 = sadd.s32 4294967295, %s1191_s27   ;;  %p1087_p0 = scmp.ge.s32.totalorder %s1191_s27, 1  ;;  %s1191_s27 = sphi %s1249_s27, %s18_s27  }
   0x2   : > { %p262_p1 = scmp.lt.s32.totalorder %s1191_s27, 3 }
   0x4   : > { %p263_p2 = pnand %p1087_p0, %p262_p1 }
   0x5   : > { %vm308_vm0 = vcmask (!%p263_p2), 351232   ;;  %p296_p3 = scmp.lt.s32.totalorder (!%p263_p2), %s1083_s28, 1  ;;  %v1193_v0 = vmov (!%p263_p2), 0.0   ;;  %v1194_v1 = vmov (!%p263_p2), 0.0|0.0   ;;  %s1195_s29 = smov (!%p263_p2), 6   ;;  %vm318_vm1 = vcmask (!%p263_p2), 293888  }
   0x6   : > { %266 = sbr.rel (%p263_p2) target bundleno = 833 (0x341), region = 52  ;;  %309 = vst.msk [vmem:[#allocation2 + $0x8] sm:$0xff] (!%p263_p2), %vm308_vm0, %v1193_v0  ;;  %311 = vst.msk [vmem:[#allocation2 + $0x18] sm:$0xff] (!%p263_p2), %vm308_vm0, %v1193_v0  ;;  %346 = vrot.lane.b32.xlu1 (!%p263_p2), %v1194_v1, %s1195_s29  ;;  %s1196_s30 = smov (!%p263_p2), 7   ;;  %v1197_v4 = vmov (!%p263_p2), 0   ;;  %vm453_vm2 = vcmask (!%p263_p2), 130048  }
   0x7   : > { %313 = vst.msk [vmem:[#allocation2 + $0x28] sm:$0xff] (!%p263_p2), %vm308_vm0, %v1193_v0  ;;  %315 = vst.msk [vmem:[#allocation2 + $0x38] sm:$0xff] (!%p263_p2), %vm308_vm0, %v1193_v0  ;;  %330 = vrot.lane.b32.xlu0 (!%p263_p2), %v1194_v1, %s1196_s30  ;;  %460 = vmatprep.subr.bf16.mxu0 (!%p263_p2), %v1197_v4  ;;  %s1198_s13 = smov (!%p263_p2), 5   ;;  %s1199_s14 = smov (!%p263_p2), 1   ;;  %v1173_v8 = vld [vmem:[%s1477_s2 + $0x4] ss:$8 sps:$4 sm:$0xff] (!%p263_p2)  }
   0x8   : > { %1170 = vset.pattern.permute.xlu1 (!%p263_p2), %v1197_v4  ;;  %1169 = vset.pattern.permute.xlu0 (!%p263_p2), %v1197_v4  ;;  %s1200_s15 = smov (!%p263_p2), 127   ;;  %s1201_s16 = smov (!%p263_p2), 123   ;;  %v510_v9 = vld [vmem:[%s1478_s3 + $0x8] sm:$0xff] (!%p263_p2)  ;;  %v509_v10 = vld [vmem:[%s1478_s3] sm:$0xff] (!%p263_p2)  ;;  %v511_v13 = vld [vmem:[%s1478_s3 + $0x10] sm:$0xff] (!%p263_p2)  ;;  %vm350_vm3 = vcmask (!%p263_p2), 48128  }
   0x9   : > { %s1202_s17 = smov (!%p263_p2), 122   ;;  %s1203_s18 = smov (!%p263_p2), 121   ;;  %1096 = vmatprep.mubr.msk.bf16.mxu0 (!%p263_p2), %vm453_vm2, %v1173_v8  ;;  %v537_v11 = vld [vmem:[%s1479_s4] sm:$0xff] (!%p263_p2)  ;;  %v538_v12 = vld [vmem:[%s1479_s4 + $0x8] sm:$0xff] (!%p263_p2)  ;;  %v512_v14 = vld [vmem:[%s1478_s3 + $0x18] sm:$0xff] (!%p263_p2)  ;;  %vm334_vm4 = vcmask (!%p263_p2), 56320  }
   0xa   : > { %v539_v15 = vld [vmem:[%s1479_s4 + $0x10] sm:$0xff] (!%p263_p2)  ;;  %v540_v16 = vld [vmem:[%s1479_s4 + $0x18] sm:$0xff] (!%p263_p2)  ;;  %vm366_vm5 = vcmask (!%p263_p2), 39936   ;;  %vm382_vm6 = vcmask (!%p263_p2), 7168   ;;  %v1171_v42 = vld [vmem:[%s1477_s2] ss:$8 sps:$4 sm:$0xff] (!%p263_p2)  }
   0xb   : > { %v1174_v43 = vld [vmem:[%s1477_s2 + $0x14] ss:$8 sps:$4 sm:$0xff] (!%p263_p2)   ;;  %v1176_v44 = vld [vmem:[%s1477_s2 + $0x10] ss:$8 sps:$4 sm:$0xff] (!%p263_p2)   ;;  %v1356_v57 = vld [vmem:[%s1476_s1] ss:$0 sm:$0xff] (!%p263_p2) }
   0xc   : > { %vm839_vm11 = vcmask (!%p263_p2), 261120  }
   0xd   : > { %s1485_s28 = smov (!%p296_p3, %s1083_s28), 1 }
   0xe   : > { %s1109_s9 = sshll.u32 %s1485_s28, 4 }
   0xf   : > { %s300_s12 = scalar_lea.vmem %s1475_s0, %s1109_s9 }
  0x10   : > { %v316_v2 = vld [vmem:[%s300_s12] sm:$0xff]  ;;  %v317_v3 = vld [vmem:[%s300_s12 + $0x8] sm:$0xff] }
  0x11   : > { %319 = vst.msk [vmem:[#allocation2 + $0x8] sm:$0xff] %vm318_vm1, %v316_v2  ;;  %320 = vst.msk [vmem:[#allocation2 + $0x18] sm:$0xff] %vm318_vm1, %v317_v3 }
  0x18   : > { %v339_v5 = vld [vmem:[#allocation2 + $0x8] sm:$0xff]  ;;  %v341_v6 = vld [vmem:[#allocation2 + $0x18] sm:$0xff] }
  0x19   : > { %v343_v7 = vpack.c.bf16 %v341_v6, %v339_v5 }
  0x1b   : > { %348 = vrot.lane.b32.xlu1 %v343_v7, %s1195_s29  ;;  %332 = vrot.lane.b32.xlu0 %v343_v7, %s1196_s30  ;;  %389 = vst.msk [vmem:[#allocation3 + $0x20] sm:$0xff] %vm318_vm1, %v343_v7 }
  0x1f   : > { %364 = vrot.lane.b32.xlu1 %v343_v7, %s1198_s13  ;;  %362 = vrot.lane.b32.xlu0 %v1194_v1, %s1198_s13 }
  0x22   : > { %v430_v37 = vld [vmem:[#allocation3 + $0x20] sm:$0xff] }
  0x23   : > { %380 = vrot.lane.b32.xlu1 %v343_v7, %s1199_s14  ;;  %378 = vrot.lane.b32.xlu0 %v1194_v1, %s1199_s14 }
  0x27   : > { %394 = vrot.lane.b32.xlu0 %v343_v7, %s1200_s15  ;;  %402 = vrot.lane.b32.xlu1 %v343_v7, %s1201_s16 }
  0x2b   : > { %410 = vrot.lane.b32.xlu0 %v343_v7, %s1202_s17  ;;  %418 = vrot.lane.b32.xlu1 %v343_v7, %s1203_s18 }
  0x2f   : > { %520 = vperm.xlu1 %1170, %v510_v9   ;;  %515 = vperm.xlu0 %1169, %v509_v10  }
  0x33   : > { %543 = vperm.xlu1 %1170, %v537_v11   ;;  %548 = vperm.xlu0 %1169, %v538_v12  }
  0x37   : > { %525 = vperm.xlu1 %1170, %v511_v13   ;;  %530 = vperm.xlu0 %1169, %v512_v14  }
  0x3b   : > { %553 = vperm.xlu1 %1170, %v539_v15   ;;  %558 = vperm.xlu0 %1169, %v540_v16  }
  0x3f   : > { %607 = vrot.lane.b32.xlu1 %v1194_v1, %s1196_s30  ;;  %641 = vrot.lane.b32.xlu0 %v1194_v1, %s1195_s29 }
  0x43   : > { %611 = vrot.lane.b32.xlu1 %v1194_v1, %s1196_s30 }
  0x47   : > { %637 = vrot.lane.b32.xlu1 %v1194_v1, %s1195_s29 }
  0x4b   : > { %667 = vrot.lane.b32.xlu1 %v1194_v1, %s1198_s13 }
  0x78   : > { %v347_v17 = vpop.permute.xlu1 %346 }
  0x79   : > { %v331_v18 = vpop.permute.xlu0 %330 }
  0x8d   : > { %v349_v19 = vpop.permute.xlu1 %348  ;;  %v333_v20 = vpop.permute.xlu0 %332 }
  0x8e   : > { %v351_v21 = vsel %vm350_vm3, %v347_v17, %v349_v19  ;;  %v335_v22 = vsel %vm334_vm4, %v331_v18, %v333_v20 }
  0x8f   : > { %353 = vst.msk [vmem:[#allocation3 + $0x8] sm:$0xff] %vm318_vm1, %v351_v21  ;;  %337 = vst.msk [vmem:[#allocation3] sm:$0xff] %vm318_vm1, %v335_v22 }
  0x91   : > { %v365_v23 = vpop.permute.xlu1 %364  ;;  %v363_v24 = vpop.permute.xlu0 %362 }
  0x92   : > { %v367_v25 = vsel %vm366_vm5, %v363_v24, %v365_v23 }
  0x93   : > { %369 = vst.msk [vmem:[#allocation3 + $0x10] sm:$0xff] %vm318_vm1, %v367_v25 }
  0x95   : > { %v381_v26 = vpop.permute.xlu1 %380  ;;  %v379_v27 = vpop.permute.xlu0 %378 }
  0x96   : > { %v426_v28 = vld [vmem:[#allocation3] sm:$0xff]  ;;  %v383_v29 = vsel %vm382_vm6, %v379_v27, %v381_v26  ;;  %v427_v32 = vld [vmem:[#allocation3 + $0x8] sm:$0xff] }
  0x97   : > { %461 = vmatpush1.bf16.msra.mxu0 %v426_v28  ;;  %385 = vst.msk [vmem:[#allocation3 + $0x18] sm:$0xff] %vm318_vm1, %v383_v29  ;;  %v944_v26 = vld [vmem:[%s1481_s6] sm:$0xff]  ;;  %v946_v28 = vld [vmem:[%s1481_s6 + $0x10] sm:$0xff] }
  0x98   : > { %462 = vmatprep.subr.bf16.mxu0 %v1197_v4  ;;  %v1179_v27 = vld [vmem:[%s1480_s5 + $0x4] ss:$12 sps:$4 sm:$0xff]  }
  0x99   : > { %v395_v30 = vpop.permute.xlu0 %394  ;;  %v403_v31 = vpop.permute.xlu1 %402  ;;  %878 = vmatprep.mubr.bf16.mxu1 %v1179_v27  ;;  %v972_v29 = vld [vmem:[%s1482_s7] sm:$0xff] }
  0x9a   : > { %397 = vst.msk [vmem:[#allocation3 + $0x28] sm:$0xff] %vm318_vm1, %v395_v30  ;;  %405 = vst.msk [vmem:[#allocation3 + $0x30] sm:$0xff] %vm318_vm1, %v403_v31  ;;  %v428_v33 = vld [vmem:[#allocation3 + $0x10] sm:$0xff]  ;;  %v947_v31 = vld [vmem:[%s1481_s6 + $0x18] sm:$0xff] }
  0x9b   : > { %463 = vmatpush1.bf16.msra.mxu0 %v427_v32  ;;  %v974_v30 = vld [vmem:[%s1482_s7 + $0x10] sm:$0xff]  ;;  %v973_v32 = vld [vmem:[%s1482_s7 + $0x8] sm:$0xff] }
  0x9c   : > { %464 = vmatprep.subr.bf16.mxu0 %v1197_v4 }
  0x9d   : > { %v411_v34 = vpop.permute.xlu0 %410  ;;  %v419_v35 = vpop.permute.xlu1 %418 }
  0x9e   : > { %413 = vst.msk [vmem:[#allocation3 + $0x38] sm:$0xff] %vm318_vm1, %v411_v34  ;;  %421 = vst.msk [vmem:[#allocation3 + $0x40] sm:$0xff] %vm318_vm1, %v419_v35  ;;  %v429_v36 = vld [vmem:[#allocation3 + $0x18] sm:$0xff] }
  0x9f   : > { %465 = vmatpush1.bf16.msra.mxu0 %v428_v33  ;;  %v975_v33 = vld [vmem:[%s1482_s7 + $0x18] sm:$0xff] }
  0xa0   : > { %466 = vmatprep.subr.bf16.mxu0 %v1197_v4 }
  0xa1   : > { %v431_v38 = vld [vmem:[#allocation3 + $0x28] sm:$0xff]  ;;  %v432_v39 = vld [vmem:[#allocation3 + $0x30] sm:$0xff] }
  0xa3   : > { %467 = vmatpush1.bf16.msra.mxu0 %v429_v36 }
  0xa4   : > { %468 = vmatprep.subr.bf16.mxu0 %v1197_v4 }
  0xa5   : > { %v433_v40 = vld [vmem:[#allocation3 + $0x38] sm:$0xff]  ;;  %v434_v41 = vld [vmem:[#allocation3 + $0x40] sm:$0xff] }
  0xa7   : > { %469 = vmatpush1.bf16.msra.mxu0 %v430_v37 }
  0xa8   : > { %470 = vmatprep.subr.bf16.mxu0 %v1197_v4 }
  0xab   : > { %471 = vmatpush1.bf16.msra.mxu0 %v431_v38 }
  0xac   : > { %472 = vmatprep.subr.bf16.mxu0 %v1197_v4 }
  0xae   : > { %v521_v45 = vpop.permute.xlu1 %520  ;;  %v516_v46 = vpop.permute.xlu0 %515 }
  0xaf   : > { %473 = vmatpush1.bf16.msra.mxu0 %v432_v39 }
  0xb0   : > { %474 = vmatprep.subr.bf16.mxu0 %v1197_v4 }
  0xb2   : > { %v544_v47 = vpop.permute.xlu1 %543  ;;  %v549_v48 = vpop.permute.xlu0 %548 }
  0xb3   : > { %475 = vmatpush1.bf16.msra.mxu0 %v433_v40 }
  0xb4   : > { %476 = vmatprep.subr.bf16.mxu0 %v1197_v4 }
  0xb6   : > { %v526_v56 = vpop.permute.xlu1 %525  ;;  %v531_v60 = vpop.permute.xlu0 %530 }
  0xb7   : > { %477 = vmatpush1.bf16.msra.mxu0 %v434_v41 }
  0xba   : > { %493 = vmatmul.mubr.bf16.vlgmr.msra.gmra.mrb[0].mxu0 %v1171_v42  ;;  %v554_v5 = vpop.permute.xlu1 %553  ;;  %v559_v11 = vpop.permute.xlu0 %558 }
  0xbb   : > { %1097 = vmatprep.mubr.msk.bf16.mxu0 %vm453_vm2, %v1174_v43 }
  0xbe   : > { %v608_v34 = vpop.permute.xlu1 %607  ;;  %v642_v38 = vpop.permute.xlu0 %641 }
  0xc2   : > { %501 = vmatmul.mubr.bf16.gmra.mrb[4].mxu0 %v1176_v44  ;;  %v612_v35 = vpop.permute.xlu1 %611 }
  0xc6   : > { %v638_v36 = vpop.permute.xlu1 %637 }
  0xca   : > { %v668_v37 = vpop.permute.xlu1 %667 }
 0x18d   : > { %v494_v49 = vpop.f32.mrb[0].mxu0 }
 0x18e   : > { %v533_v50 = vmul.f32 %v516_v46, %v494_v49  ;;  %v496_v51 = vpop.f32.mrb[1].mxu0 }
 0x18f   : > { %v497_v52 = vpop.f32.mrb[2].mxu0 }
 0x190   : > { %v561_v53 = vadd.f32 %v544_v47, %v533_v50  ;;  %v534_v54 = vmul.f32 %v521_v45, %v497_v52  ;;  %v499_v55 = vpop.f32.mrb[3].mxu0 }
 0x192   : > { %vm565_vm7 = vcmp.ge.f32.partialorder %v561_v53, 0.0  ;;  %v569_v58 = vmul.f32 0.2, %v561_v53  ;;  %v562_v59 = vadd.f32 %v549_v48, %v534_v54 }
 0x194   : > { %v573_v61 = vsel %vm565_vm7, %v561_v53, %v569_v58  ;;  %vm566_vm8 = vcmp.ge.f32.partialorder %v562_v59, 0.0  ;;  %v570_v62 = vmul.f32 0.2, %v562_v59 }
 0x195   : > { %v583_v63 = vmul.f32 %v1356_v57, %v573_v61  ;;  %v502_v0 = vpop.f32.mrb[4].mxu0 }
 0x196   : > { %v574_v2 = vsel %vm566_vm8, %v562_v59, %v570_v62  ;;  %v535_v3 = vmul.f32 %v526_v56, %v502_v0  ;;  %v504_v4 = vpop.f32.mrb[5].mxu0 }
 0x197   : > { %587 = vst.msk [vmem:[#allocation2 + $0x8] sm:$0xff] %vm318_vm1, %v583_v63  ;;  %v584_v6 = vmul.f32 %v1356_v57, %v574_v2  ;;  %v505_v7 = vpop.f32.mrb[6].mxu0 }
 0x198   : > { %v563_v8 = vadd.f32 %v554_v5, %v535_v3  ;;  %v536_v9 = vmul.f32 %v531_v60, %v505_v7  ;;  %v507_v10 = vpop.f32.mrb[7].mxu0 }
 0x199   : > { %588 = vst.msk [vmem:[#allocation2 + $0x18] sm:$0xff] %vm318_vm1, %v584_v6 }
 0x19a   : > { %vm567_vm9 = vcmp.ge.f32.partialorder %v563_v8, 0.0  ;;  %v571_v12 = vmul.f32 0.2, %v563_v8  ;;  %v564_v13 = vadd.f32 %v559_v11, %v536_v9 }
 0x19c   : > { %v575_v14 = vsel %vm567_vm9, %v563_v8, %v571_v12  ;;  %vm568_vm10 = vcmp.ge.f32.partialorder %v564_v13, 0.0  ;;  %v572_v15 = vmul.f32 0.2, %v564_v13 }
 0x19d   : > { %v585_v16 = vmul.f32 %v1356_v57, %v575_v14 }
 0x19e   : > { %v576_v17 = vsel %vm568_vm10, %v564_v13, %v572_v15  ;;  %v719_v19 = vld [vmem:[#allocation2 + $0x8] sm:$0xff] }
 0x19f   : > { %589 = vst.msk [vmem:[#allocation2 + $0x28] sm:$0xff] %vm318_vm1, %v585_v16  ;;  %v586_v18 = vmul.f32 %v1356_v57, %v576_v17 }
 0x1a0   : > { %v720_v20 = vld [vmem:[#allocation2 + $0x18] sm:$0xff] }
 0x1a1   : > { %590 = vst.msk [vmem:[#allocation2 + $0x38] sm:$0xff] %vm318_vm1, %v586_v18  ;;  %v723_v21 = vpack.c.bf16 %v720_v20, %v719_v19  ;;  %v1177_v19 = vld [vmem:[%s1480_s5] ss:$12 sps:$4 sm:$0xff]  }
 0x1a3   : > { %727 = vrot.lane.b32.xlu1 %v723_v21, %s1200_s15  ;;  %609 = vrot.lane.b32.xlu0 %v723_v21, %s1196_s30  ;;  %717 = vst.msk [vmem:[#allocation3 + $0x40] sm:$0xff] %vm318_vm1, %v723_v21 }
 0x1a6   : > { %v626_v22 = vld [vmem:[#allocation2 + $0x28] sm:$0xff] }
 0x1a7   : > { %743 = vrot.lane.b32.xlu1 %v723_v21, %s1201_s16  ;;  %639 = vrot.lane.b32.xlu0 %v723_v21, %s1195_s29 }
 0x1a8   : > { %v628_v23 = vld [vmem:[#allocation2 + $0x38] sm:$0xff] }
 0x1a9   : > { %v632_v24 = vpack.c.bf16 %v628_v23, %v626_v22  ;;  %v1182_v23 = vld [vmem:[%s1480_s5 + $0x18] ss:$12 sps:$4 sm:$0xff]  }
 0x1aa   : > { %v799_v25 = vld [vmem:[#allocation3 + $0x40] sm:$0xff] }
 0x1ab   : > { %1111 = vmatprep.subr.bf16.mxu1 %v799_v25  ;;  %669 = vrot.lane.b32.xlu0 %v723_v21, %s1198_s13  ;;  %718 = vst.msk [vmem:[#allocation3 + $0x48] sm:$0xff] %vm318_vm1, %v632_v24  ;;  %v1184_v25 = vld [vmem:[%s1480_s5 + $0x20] ss:$12 sps:$4 sm:$0xff]  }
 0x1ac   : > { %643 = vrot.lane.b32.xlu1 %v632_v24, %s1195_s29 }
 0x1af   : > { %613 = vrot.lane.b32.xlu0 %v632_v24, %s1196_s30 }
 0x1b0   : > { %697 = vrot.lane.b32.xlu1 %v1194_v1, %s1199_s14 }
 0x1b2   : > { %v800_v50 = vld [vmem:[#allocation3 + $0x48] sm:$0xff] }
 0x1b3   : > { %671 = vrot.lane.b32.xlu0 %v1194_v1, %s1198_s13 }
 0x1b4   : > { %673 = vrot.lane.b32.xlu1 %v632_v24, %s1198_s13 }
 0x1b7   : > { %729 = vrot.lane.b32.xlu0 %v632_v24, %s1200_s15 }
 0x1b8   : > { %759 = vrot.lane.b32.xlu1 %v723_v21, %s1202_s17 }
 0x1bb   : > { %699 = vrot.lane.b32.xlu0 %v723_v21, %s1199_s14 }
 0x1bc   : > { %703 = vrot.lane.b32.xlu1 %v632_v24, %s1199_s14 }
 0x1bf   : > { %745 = vrot.lane.b32.xlu0 %v632_v24, %s1201_s16 }
 0x1c0   : > { %775 = vrot.lane.b32.xlu1 %v723_v21, %s1203_s18  ;;  %v1180_v21 = vld [vmem:[%s1480_s5 + $0x1c] ss:$12 sps:$4 sm:$0xff]  }
 0x1c3   : > { %701 = vrot.lane.b32.xlu0 %v1194_v1, %s1199_s14  ;;  %v945_v1 = vld [vmem:[%s1481_s6 + $0x8] sm:$0xff]  ;;  %s1110_s14 = sshll.u32 %s1485_s28, 5 }
 0x1c4   : > { %950 = vperm.xlu1 %1170, %v944_v26   ;;  %s305_s26 = scalar_lea.vmem %s1483_s8, %s1110_s14 }
 0x1c7   : > { %761 = vrot.lane.b32.xlu0 %v632_v24, %s1202_s17 }
 0x1c8   : > { %960 = vperm.xlu1 %1170, %v946_v28  }
 0x1cb   : > { %777 = vrot.lane.b32.xlu0 %v632_v24, %s1203_s18  ;;  %v1183_v24 = vld [vmem:[%s1480_s5 + $0x8] ss:$12 sps:$4 sm:$0xff]  }
 0x1cc   : > { %978 = vperm.xlu1 %1170, %v972_v29  }
 0x1cf   : > { %955 = vperm.xlu0 %1169, %v945_v1  }
 0x1d0   : > { %988 = vperm.xlu1 %1170, %v974_v30  }
 0x1d3   : > { %965 = vperm.xlu0 %1169, %v947_v31  }
 0x1d7   : > { %983 = vperm.xlu0 %1169, %v973_v32  }
 0x1db   : > { %993 = vperm.xlu0 %1169, %v975_v33  }
 0x215   : > { %v728_v39 = vpop.permute.xlu1 %727  ;;  %v610_v40 = vpop.permute.xlu0 %609 }
 0x216   : > { %733 = vst.msk [vmem:[#allocation3 + $0x50] sm:$0xff] %vm318_vm1, %v728_v39  ;;  %v615_v41 = vsel %vm334_vm4, %v608_v34, %v610_v40 }
 0x217   : > { %619 = vst.msk [vmem:[#allocation3] sm:$0xff] %vm318_vm1, %v615_v41 }
 0x219   : > { %v744_v42 = vpop.permute.xlu1 %743  ;;  %v640_v43 = vpop.permute.xlu0 %639 }
 0x21a   : > { %749 = vst.msk [vmem:[#allocation3 + $0x60] sm:$0xff] %vm318_vm1, %v744_v42  ;;  %v645_v44 = vsel %vm350_vm3, %v638_v36, %v640_v43 }
 0x21b   : > { %649 = vst.msk [vmem:[#allocation3 + $0x10] sm:$0xff] %vm318_vm1, %v645_v44 }
 0x21d   : > { %v670_v45 = vpop.permute.xlu0 %669  ;;  %v801_v61 = vld [vmem:[#allocation3 + $0x50] sm:$0xff] }
 0x21e   : > { %v644_v46 = vpop.permute.xlu1 %643  ;;  %v675_v47 = vsel %vm366_vm5, %v668_v37, %v670_v45  ;;  %v791_v48 = vld [vmem:[#allocation3] sm:$0xff] }
 0x21f   : > { %v646_v49 = vsel %vm350_vm3, %v642_v38, %v644_v46  ;;  %679 = vst.msk [vmem:[#allocation3 + $0x20] sm:$0xff] %vm318_vm1, %v675_v47  ;;  %1112 = vmatpush3.bf16.msra.mxu1 %v791_v48 }
 0x220   : > { %650 = vst.msk [vmem:[#allocation3 + $0x18] sm:$0xff] %vm318_vm1, %v646_v49  ;;  %1113 = vmatprep.subr.bf16.mxu1 %v800_v50 }
 0x221   : > { %v614_v51 = vpop.permute.xlu0 %613  ;;  %v803_v7 = vld [vmem:[#allocation3 + $0x60] sm:$0xff] }
 0x222   : > { %v698_v52 = vpop.permute.xlu1 %697  ;;  %v616_v53 = vsel %vm334_vm4, %v612_v35, %v614_v51  ;;  %v793_v2 = vld [vmem:[#allocation3 + $0x10] sm:$0xff] }
 0x223   : > { %620 = vst.msk [vmem:[#allocation3 + $0x8] sm:$0xff] %vm318_vm1, %v616_v53 }
 0x225   : > { %v672_v54 = vpop.permute.xlu0 %671 }
 0x226   : > { %v674_v55 = vpop.permute.xlu1 %673  ;;  %v795_v10 = vld [vmem:[#allocation3 + $0x20] sm:$0xff] }
 0x227   : > { %v676_v56 = vsel %vm366_vm5, %v672_v54, %v674_v55  ;;  %v794_v6 = vld [vmem:[#allocation3 + $0x18] sm:$0xff] }
 0x228   : > { %680 = vst.msk [vmem:[#allocation3 + $0x28] sm:$0xff] %vm318_vm1, %v676_v56 }
 0x229   : > { %v730_v58 = vpop.permute.xlu0 %729 }
 0x22a   : > { %v760_v59 = vpop.permute.xlu1 %759  ;;  %734 = vst.msk [vmem:[#allocation3 + $0x58] sm:$0xff] %vm318_vm1, %v730_v58  ;;  %v792_v60 = vld [vmem:[#allocation3 + $0x8] sm:$0xff] }
 0x22b   : > { %765 = vst.msk [vmem:[#allocation3 + $0x70] sm:$0xff] %vm318_vm1, %v760_v59  ;;  %1114 = vmatpush3.bf16.msra.mxu1 %v792_v60 }
 0x22c   : > { %1115 = vmatprep.subr.bf16.mxu1 %v801_v61 }
 0x22d   : > { %v700_v62 = vpop.permute.xlu0 %699 }
 0x22e   : > { %v704_v63 = vpop.permute.xlu1 %703  ;;  %v705_v0 = vsel %vm382_vm6, %v698_v52, %v700_v62 }
 0x22f   : > { %709 = vst.msk [vmem:[#allocation3 + $0x30] sm:$0xff] %vm318_vm1, %v705_v0  ;;  %1116 = vmatpush3.bf16.msra.mxu1 %v793_v2  ;;  %v796_v13 = vld [vmem:[#allocation3 + $0x28] sm:$0xff] }
 0x231   : > { %v746_v3 = vpop.permute.xlu0 %745  ;;  %v802_v4 = vld [vmem:[#allocation3 + $0x58] sm:$0xff] }
 0x232   : > { %v776_v5 = vpop.permute.xlu1 %775  ;;  %750 = vst.msk [vmem:[#allocation3 + $0x68] sm:$0xff] %vm318_vm1, %v746_v3  ;;  %1117 = vmatprep.subr.bf16.mxu1 %v802_v4  ;;  %v805_v14 = vld [vmem:[#allocation3 + $0x70] sm:$0xff] }
 0x233   : > { %781 = vst.msk [vmem:[#allocation3 + $0x80] sm:$0xff] %vm318_vm1, %v776_v5  ;;  %1118 = vmatpush3.bf16.msra.mxu1 %v794_v6 }
 0x234   : > { %1119 = vmatprep.subr.bf16.mxu1 %v803_v7 }
 0x235   : > { %v702_v8 = vpop.permute.xlu0 %701 }
 0x236   : > { %v706_v9 = vsel %vm382_vm6, %v702_v8, %v704_v63  ;;  %v797_v16 = vld [vmem:[#allocation3 + $0x30] sm:$0xff] }
 0x237   : > { %710 = vst.msk [vmem:[#allocation3 + $0x38] sm:$0xff] %vm318_vm1, %v706_v9  ;;  %1120 = vmatpush3.bf16.msra.mxu1 %v795_v10 }
 0x239   : > { %v762_v11 = vpop.permute.xlu0 %761  ;;  %v804_v12 = vld [vmem:[#allocation3 + $0x68] sm:$0xff] }
 0x23a   : > { %766 = vst.msk [vmem:[#allocation3 + $0x78] sm:$0xff] %vm318_vm1, %v762_v11  ;;  %1121 = vmatprep.subr.bf16.mxu1 %v804_v12  ;;  %v807_v20 = vld [vmem:[#allocation3 + $0x80] sm:$0xff] }
 0x23b   : > { %1122 = vmatpush3.bf16.msra.mxu1 %v796_v13 }
 0x23c   : > { %1123 = vmatprep.subr.bf16.mxu1 %v805_v14 }
 0x23d   : > { %v778_v15 = vpop.permute.xlu0 %777 }
 0x23e   : > { %782 = vst.msk [vmem:[#allocation3 + $0x88] sm:$0xff] %vm318_vm1, %v778_v15  ;;  %v798_v18 = vld [vmem:[#allocation3 + $0x38] sm:$0xff] }
 0x23f   : > { %1124 = vmatpush3.bf16.msra.mxu1 %v797_v16 }
 0x241   : > { %v806_v17 = vld [vmem:[#allocation3 + $0x78] sm:$0xff] }
 0x242   : > { %1125 = vmatprep.subr.bf16.mxu1 %v806_v17 }
 0x243   : > { %1126 = vmatpush3.bf16.msra.mxu1 %v798_v18  ;;  %v951_v28 = vpop.permute.xlu1 %950 }
 0x244   : > { %1143 = vmatprep.subr.bf16.mxu1 %v807_v20 }
 0x245   : > { %v808_v22 = vld [vmem:[#allocation3 + $0x88] sm:$0xff] }
 0x246   : > { %879 = vmatmul.mubr.bf16.vlgmr.msra.gmra.mrb[0].mxu1 %v1177_v19 }
 0x247   : > { %1144 = vmatpush3.bf16.msra.mxu1 %v807_v20  ;;  %886 = vmatprep.mubr.bf16.mxu1 %v1180_v21  ;;  %v961_v33 = vpop.permute.xlu1 %960 }
 0x248   : > { %1145 = vmatprep.subr.bf16.mxu1 %v808_v22 }
 0x24b   : > { %1146 = vmatpush3.bf16.msra.mxu1 %v808_v22  ;;  %v979_v41 = vpop.permute.xlu1 %978 }
 0x24e   : > { %887 = vmatmul.mubr.bf16.gmra.mrb[4].mxu1 %v1182_v23  ;;  %v956_v31 = vpop.permute.xlu0 %955 }
 0x24f   : > { %1147 = vmatprep.mubr.msk.bf16.mxu1 %vm839_vm11, %v1183_v24  ;;  %v989_v51 = vpop.permute.xlu1 %988 }
 0x252   : > { %v966_v36 = vpop.permute.xlu0 %965 }
 0x256   : > { %1148 = vmatmul.mubr.msk.bf16.vlgmr.msra.gmra.mrb[8].mxu1 %vm839_vm11, %v1184_v25  ;;  %v984_v42 = vpop.permute.xlu0 %983 }
 0x25a   : > { %v994_v56 = vpop.permute.xlu0 %993 }
 0x319   : > { %v1127_v26 = vpop.f32.mrb[0].mxu1 }
 0x31a   : > { %v1128_v27 = vpop.f32.mrb[1].mxu1 }
 0x31b   : > { %v1129_v29 = vadd.f32 %v1128_v27, %v1127_v26  ;;  %v1130_v1 = vpop.f32.mrb[2].mxu1 }
 0x31c   : > { %v1131_v30 = vpop.f32.mrb[3].mxu1 }
 0x31d   : > { %v1132_v32 = vadd.f32 %v1131_v30, %v1130_v1 }
 0x321   : > { %v1133_v34 = vpop.f32.mrb[4].mxu1 }
 0x322   : > { %v1134_v35 = vpop.f32.mrb[5].mxu1 }
 0x323   : > { %v1135_v37 = vadd.f32 %v1134_v35, %v1133_v34  ;;  %v1136_v38 = vpop.f32.mrb[6].mxu1 }
 0x324   : > { %v1137_v39 = vpop.f32.mrb[7].mxu1 }
 0x325   : > { %v1138_v40 = vadd.f32 %v1137_v39, %v1136_v38 }
 0x329   : > { %v1149_v43 = vpop.f32.mrb[8].mxu1 }
 0x32a   : > { %v938_v44 = vadd.f32 %v1149_v43, %v1135_v37  ;;  %v929_v45 = vpop.f32.mrb[9].mxu1 }
 0x32b   : > { %v930_v46 = vadd.f32 %v1129_v29, %v929_v45  ;;  %v1150_v47 = vpop.f32.mrb[10].mxu1 }
 0x32c   : > { %v970_v48 = vmul.f32 %v961_v33, %v938_v44  ;;  %v941_v49 = vadd.f32 %v1150_v47, %v1138_v40  ;;  %v932_v50 = vpop.f32.mrb[11].mxu1 }
 0x32d   : > { %v968_v52 = vmul.f32 %v951_v28, %v930_v46  ;;  %v933_v53 = vadd.f32 %v1132_v32, %v932_v50 }
 0x32e   : > { %v998_v54 = vadd.f32 %v989_v51, %v970_v48  ;;  %v971_v55 = vmul.f32 %v966_v36, %v941_v49 }
 0x32f   : > { %v996_v58 = vadd.f32 %v979_v41, %v968_v52  ;;  %v969_v59 = vmul.f32 %v956_v31, %v933_v53 }
 0x330   : > { %vm1002_vm12 = vcmp.ge.f32.partialorder %v998_v54, 0.0  ;;  %v1006_v60 = vmul.f32 0.2, %v998_v54  ;;  %v999_v61 = vadd.f32 %v994_v56, %v971_v55 }
 0x331   : > { %vm1000_vm13 = vcmp.ge.f32.partialorder %v996_v58, 0.0  ;;  %v1004_v62 = vmul.f32 0.2, %v996_v58  ;;  %v997_v63 = vadd.f32 %v984_v42, %v969_v59 }
 0x332   : > { %v1010_v0 = vsel %vm1002_vm12, %v998_v54, %v1006_v60  ;;  %vm1003_vm14 = vcmp.ge.f32.partialorder %v999_v61, 0.0  ;;  %v1007_v2 = vmul.f32 0.2, %v999_v61 }
 0x333   : > { %v1014_v3 = vmul.f32 %v1356_v57, %v1010_v0  ;;  %v1008_v4 = vsel %vm1000_vm13, %v996_v58, %v1004_v62  ;;  %vm1001_vm15 = vcmp.ge.f32.partialorder %v997_v63, 0.0  ;;  %v1005_v5 = vmul.f32 0.2, %v997_v63 }
 0x334   : > { %v1012_v6 = vmul.f32 %v1356_v57, %v1008_v4  ;;  %v1011_v7 = vsel %vm1003_vm14, %v999_v61, %v1007_v2 }
 0x335   : > { %1018 = vst.msk [vmem:[#allocation2 + $0x28] sm:$0xff] %vm318_vm1, %v1014_v3  ;;  %v1015_v8 = vmul.f32 %v1356_v57, %v1011_v7  ;;  %v1009_v9 = vsel %vm1001_vm15, %v997_v63, %v1005_v5 }
 0x336   : > { %1016 = vst.msk [vmem:[#allocation2 + $0x8] sm:$0xff] %vm318_vm1, %v1012_v6  ;;  %v1013_v10 = vmul.f32 %v1356_v57, %v1009_v9 }
 0x337   : > { %1019 = vst.msk [vmem:[#allocation2 + $0x38] sm:$0xff] %vm318_vm1, %v1015_v8 }
 0x338   : > { %1017 = vst.msk [vmem:[#allocation2 + $0x18] sm:$0xff] %vm318_vm1, %v1013_v10 }
 0x33c   : > { %v1022_v11 = vld [vmem:[#allocation2 + $0x28] sm:$0xff] }
 0x33d   : > { %1026 = vst.msk [vmem:[%s305_s26 + $0x10] sm:$0xff] %vm318_vm1, %v1022_v11  ;;  %v1020_v12 = vld [vmem:[#allocation2 + $0x8] sm:$0xff] }
 0x33e   : > { %1024 = vst.msk [vmem:[%s305_s26] sm:$0xff] %vm318_vm1, %v1020_v12  ;;  %v1023_v13 = vld [vmem:[#allocation2 + $0x38] sm:$0xff] }
 0x33f   : > { %1027 = vst.msk [vmem:[%s305_s26 + $0x18] sm:$0xff] %vm318_vm1, %v1023_v13  ;;  %v1021_v14 = vld [vmem:[#allocation2 + $0x18] sm:$0xff] }
 0x340   : > { %1025 = vst.msk [vmem:[%s305_s26 + $0x8] sm:$0xff] %vm318_vm1, %v1021_v14 }
 0x341 PF: > { %s18_s27 = sadd.s32 1, %s1191_s27  }
 0x342   : > { %p15_p4 = scmp.ge.s32.totalorder %s18_s27, 4  }
 0x344   :  { %17 = sbr.rel (!%p15_p4) target bundleno = 1 (0x1), region = 82 }

</bundles_post_ra>
